<compile_context>
chip_gen: v7x
topology: tpu7x:2x2x1
jax: 0.10.0
libtpu: 0.0.40
codegen_flags: <defaults>
</compile_context>

<pallas_src>
import functools

import jax
import jax.numpy as jnp
from jax.experimental import pallas as pl
from jax.experimental.pallas import tpu as pltpu

N_CLASSES = 10   # "n" of MNISTEncoder
PAD = 128        # lane-dense width for the 30-wide hidden and n-wide output
K_PAD = 896      # 784 -> 7*128, lane-dense/aligned K for the first matmul
ALIGN = 16       # sublane alignment for bf16 x tiles (also satisfies f32's 8)
TB_MAX = 512     # max batch-tile rows (fits every generation's VMEM budget)


def _round_up(x, m):
    return (x + m - 1) // m * m


def mnist_encoder_kernel(x_ref,
                         w1_ref, b1_ref,
                         w2_ref, b2_ref,
                         w3_ref, b3_ref,
                         w4_ref, b4_ref,
                         w5_ref, b5_ref,
                         o_ref, *, n):
    # Matmuls hit the MXU with bf16 inputs / f32 accumulation; bias, ReLU and
    # softmax run in f32 on the VPU/EUP.
    x = x_ref[...]                                                        # [TB, 896] bf16

    h = jnp.dot(x, w1_ref[...], preferred_element_type=jnp.float32) + b1_ref[...]
    h = jnp.maximum(h, 0.0).astype(jnp.bfloat16)                          # [TB, 512]

    h = jnp.dot(h, w2_ref[...], preferred_element_type=jnp.float32) + b2_ref[...]
    h = jnp.maximum(h, 0.0).astype(jnp.bfloat16)                          # [TB, 256]

    h = jnp.dot(h, w3_ref[...], preferred_element_type=jnp.float32) + b3_ref[...]
    h = jnp.maximum(h, 0.0).astype(jnp.bfloat16)                          # [TB, 128]

    h = jnp.dot(h, w4_ref[...], preferred_element_type=jnp.float32) + b4_ref[...]
    h = jnp.maximum(h, 0.0).astype(jnp.bfloat16)                          # [TB, 128] (cols >=30 are 0)

    logits = jnp.dot(h, w5_ref[...], preferred_element_type=jnp.float32) + b5_ref[...]
    # Mask the zero-padded logit columns so the softmax only sees the real n classes.
    col = jax.lax.broadcasted_iota(jnp.int32, logits.shape, 1)
    logits = jnp.where(col < n, logits, jnp.float32(-1e30))

    m = jnp.max(logits, axis=-1, keepdims=True)
    e = jnp.exp(logits - m)
    s = jnp.sum(e, axis=-1, keepdims=True)
    # Exact divide (not approx reciprocal) so each row sums to 1 to f32 precision.
    o_ref[...] = (e / s).astype(o_ref.dtype)                              # [TB, 128]


def _pick_batch_tiling(B):
    """Return (TB, B_pad): TB multiple of ALIGN, capped at TB_MAX, and chosen so
    the grid has >= 2 steps whenever the batch is big enough (v7x megacore)."""
    Bp = _round_up(max(B, 1), ALIGN)
    if Bp <= ALIGN:
        TB = Bp
    else:
        TB = min(TB_MAX, _round_up((Bp + 1) // 2, ALIGN))
    B_pad = _round_up(Bp, TB)
    return TB, B_pad


def mnist_encoder_forward(x, params, n=N_CLASSES):
    """x: [..., C, H, W] with C*H*W == 784. Returns [..., n] (leading dims kept)."""
    lead = x.shape[:-3]
    # bf16 activations into the kernel (halves the dominant HBM read); the cast
    # fuses with the pad below into a single producer.
    x2d = x.reshape(-1, 784).astype(jnp.bfloat16)
    B = x2d.shape[0]

    TB, B_pad = _pick_batch_tiling(B)
    # One pad op: batch rows to B_pad, feature dim 784 -> 896 (lane-dense K).
    x2d = jnp.pad(x2d, ((0, B_pad - B), (0, K_PAD - 784)))

    (w1, b1), (w2, b2), (w3, b3), (w4, b4), (w5, b5) = params

    # bf16 weights for the MXU; biases stay f32 (added to the f32 accumulator).
    w1p = jnp.pad(w1, ((0, K_PAD - w1.shape[0]), (0, 0))).astype(jnp.bfloat16)  # [896, 512]
    w2b = w2.astype(jnp.bfloat16)                                               # [512, 256]
    w3b = w3.astype(jnp.bfloat16)                                               # [256, 128]
    # Lane-dense tail: pad 30-wide hidden and n-wide output to 128 lanes.
    w4p = jnp.pad(w4, ((0, 0), (0, PAD - w4.shape[1]))).astype(jnp.bfloat16)    # [128, 128]
    b4p = jnp.pad(b4, ((0, 0), (0, PAD - b4.shape[1])))                         # [1, 128]
    w5p = jnp.pad(w5, ((0, PAD - w5.shape[0]), (0, PAD - w5.shape[1]))).astype(jnp.bfloat16)  # [128, 128]
    b5p = jnp.pad(b5, ((0, 0), (0, PAD - b5.shape[1])))                         # [1, 128]

    weights = (w1p, b1, w2b, b2, w3b, b3, w4p, b4p, w5p, b5p)

    def resident(a):
        # Full-array block with a constant index_map -> stays in VMEM across steps.
        return pl.BlockSpec(a.shape, lambda i: (0, 0))

    grid = (B_pad // TB,)

    flops = 2 * B_pad * (K_PAD * 512 + 512 * 256 + 256 * 128 + 128 * PAD + PAD * PAD)
    bytes_w = sum(int(a.size) * a.dtype.itemsize for a in weights)
    bytes_accessed = int(bytes_w + x2d.size * 2 + B_pad * PAD * 4)

    out = pl.pallas_call(
        functools.partial(mnist_encoder_kernel, n=n),
        out_shape=jax.ShapeDtypeStruct((B_pad, PAD), jnp.float32),
        grid=grid,
        in_specs=[pl.BlockSpec((TB, K_PAD), lambda i: (i, 0))]
                 + [resident(a) for a in weights],
        out_specs=pl.BlockSpec((TB, PAD), lambda i: (i, 0)),
        compiler_params=pltpu.CompilerParams(
            dimension_semantics=("parallel",),
            vmem_limit_bytes=32 * 1024 * 1024,
        ),
        cost_estimate=pl.CostEstimate(
            flops=flops,
            transcendentals=B_pad * PAD,
            bytes_accessed=bytes_accessed,
        ),
    )(x2d, *weights)

    return out[:B, :n].reshape(*lead, n)


def init_params(key, n=N_CLASSES):
    dims = [784, 512, 256, 128, 30, n]
    params = []
    for i in range(len(dims) - 1):
        key, kw, kb = jax.random.split(key, 3)
        fan_in, fan_out = dims[i], dims[i + 1]
        bound = 1.0 / jnp.sqrt(fan_in)
        # (in, out) layout so the kernel does y = x @ W + b  (== torch x @ W_t.T + b).
        w = jax.random.uniform(kw, (fan_in, fan_out), jnp.float32, -bound, bound)
        b = jax.random.uniform(kb, (1, fan_out), jnp.float32, -bound, bound)
        params.append((w, b))
    return params


def reference_forward_f32(x, params, n=N_CLASSES):
    """Pure-JAX f32 reference mirroring the PyTorch module."""
    lead = x.shape[:-3]
    h = x.reshape(-1, 784).astype(jnp.float32)
    for i, (w, b) in enumerate(params):
        h = h @ w + b
        if i < len(params) - 1:
            h = jnp.maximum(h, 0.0)
    return jax.nn.softmax(h, axis=-1).reshape(*lead, n)


def reference_forward_bf16(x, params, n=N_CLASSES):
    """Reference that mirrors the kernel's bf16-input / f32-accumulate matmuls."""
    lead = x.shape[:-3]
    h = x.reshape(-1, 784).astype(jnp.float32)
    for i, (w, b) in enumerate(params):
        h = jnp.dot(h.astype(jnp.bfloat16), w.astype(jnp.bfloat16),
                    preferred_element_type=jnp.float32) + b
        if i < len(params) - 1:
            h = jnp.maximum(h, 0.0)
    return jax.nn.softmax(h, axis=-1).reshape(*lead, n)


if __name__ == "__main__":
    key = jax.random.PRNGKey(0)
    kx, kp = jax.random.split(key)

    # Module-consistent input: [B, C, H, W] = [2, 1, 28, 28]  (C*H*W = 784)
    x = jax.random.normal(kx, (2, 1, 28, 28), dtype=jnp.float32)
    params = init_params(kp, n=N_CLASSES)

    out = mnist_encoder_forward(x, params, n=N_CLASSES)
    out = jax.block_until_ready(out)

    ref_bf16 = reference_forward_bf16(x, params, n=N_CLASSES)
    ref_f32 = reference_forward_f32(x, params, n=N_CLASSES)

    assert out.shape == (2, N_CLASSES), out.shape
    assert jnp.allclose(out, ref_bf16, atol=5e-3, rtol=1e-2), "mismatch vs bf16-consistent reference"
    assert jnp.allclose(out, ref_f32, atol=3e-2, rtol=3e-2), "mismatch vs f32 reference"
    assert jnp.allclose(jnp.sum(out, axis=-1), 1.0, atol=1e-4), "softmax rows must sum to 1"

    print("KERNEL_OK")
</pallas_src>

<mosaic_0001>
module attributes {stable_mosaic.version = 11 : i64} {
  func.func @mnist_encoder_kernel(%arg0: i32, %arg1: memref<16x896xbf16, #tpu.memory_space<vmem>>, %arg2: memref<896x512xbf16, #tpu.memory_space<vmem>>, %arg3: memref<1x512xf32, #tpu.memory_space<vmem>>, %arg4: memref<512x256xbf16, #tpu.memory_space<vmem>>, %arg5: memref<1x256xf32, #tpu.memory_space<vmem>>, %arg6: memref<256x128xbf16, #tpu.memory_space<vmem>>, %arg7: memref<1x128xf32, #tpu.memory_space<vmem>>, %arg8: memref<128x128xbf16, #tpu.memory_space<vmem>>, %arg9: memref<1x128xf32, #tpu.memory_space<vmem>>, %arg10: memref<128x128xbf16, #tpu.memory_space<vmem>>, %arg11: memref<1x128xf32, #tpu.memory_space<vmem>>, %arg12: memref<16x128xf32, #tpu.memory_space<vmem>>) attributes {dimension_semantics = [#tpu.dimension_semantics<parallel>], iteration_bounds = array<i64: 1>, scalar_prefetch = 0 : i64, scratch_operands = 0 : i64, tpu.core_type = #tpu.core_type<tc>, window_params = [{transform_indices = @transform_0, window_bounds = array<i64: 16, 896>}, {pipeline_mode = #tpu.pipeline_mode<synchronous>, transform_indices = @transform_1, window_bounds = array<i64: 896, 512>}, {pipeline_mode = #tpu.pipeline_mode<synchronous>, transform_indices = @transform_2, window_bounds = array<i64: 1, 512>}, {pipeline_mode = #tpu.pipeline_mode<synchronous>, transform_indices = @transform_3, window_bounds = array<i64: 512, 256>}, {pipeline_mode = #tpu.pipeline_mode<synchronous>, transform_indices = @transform_4, window_bounds = array<i64: 1, 256>}, {pipeline_mode = #tpu.pipeline_mode<synchronous>, transform_indices = @transform_5, window_bounds = array<i64: 256, 128>}, {pipeline_mode = #tpu.pipeline_mode<synchronous>, transform_indices = @transform_6, window_bounds = array<i64: 1, 128>}, {pipeline_mode = #tpu.pipeline_mode<synchronous>, transform_indices = @transform_7, window_bounds = array<i64: 128, 128>}, {pipeline_mode = #tpu.pipeline_mode<synchronous>, transform_indices = @transform_8, window_bounds = array<i64: 1, 128>}, {pipeline_mode = #tpu.pipeline_mode<synchronous>, transform_indices = @transform_9, window_bounds = array<i64: 128, 128>}, {pipeline_mode = #tpu.pipeline_mode<synchronous>, transform_indices = @transform_10, window_bounds = array<i64: 1, 128>}, {transform_indices = @transform_11, window_bounds = array<i64: 16, 128>}]} {
    %c0 = arith.constant 0 : index
    %c0_0 = arith.constant 0 : index
    %0 = vector.load %arg1[%c0, %c0_0] : memref<16x896xbf16, #tpu.memory_space<vmem>>, vector<16x896xbf16>
    %c0_1 = arith.constant 0 : index
    %c0_2 = arith.constant 0 : index
    %1 = vector.load %arg2[%c0_1, %c0_2] : memref<896x512xbf16, #tpu.memory_space<vmem>>, vector<896x512xbf16>
    %cst = arith.constant dense<0.000000e+00> : vector<16x512xf32>
    %2 = tpu.matmul %0, %1, %cst {dimension_numbers = #tpu.dot_dimension_numbers<[1], [0], [0], [1], [0, 0, 1, 1], [], []>} : vector<16x896xbf16>, vector<896x512xbf16>, vector<16x512xf32> -> vector<16x512xf32>
    %c0_3 = arith.constant 0 : index
    %c0_4 = arith.constant 0 : index
    %3 = vector.load %arg3[%c0_3, %c0_4] : memref<1x512xf32, #tpu.memory_space<vmem>>, vector<1x512xf32>
    %4 = vector.broadcast %3 : vector<1x512xf32> to vector<16x512xf32>
    %5 = arith.addf %2, %4 : vector<16x512xf32>
    %cst_5 = arith.constant 0.000000e+00 : f32
    %6 = vector.broadcast %cst_5 : f32 to vector<16x512xf32>
    %7 = arith.maximumf %5, %6 : vector<16x512xf32>
    %8 = arith.truncf %7 : vector<16x512xf32> to vector<16x512xbf16>
    %c0_6 = arith.constant 0 : index
    %c0_7 = arith.constant 0 : index
    %9 = vector.load %arg4[%c0_6, %c0_7] : memref<512x256xbf16, #tpu.memory_space<vmem>>, vector<512x256xbf16>
    %cst_8 = arith.constant dense<0.000000e+00> : vector<16x256xf32>
    %10 = tpu.matmul %8, %9, %cst_8 {dimension_numbers = #tpu.dot_dimension_numbers<[1], [0], [0], [1], [0, 0, 1, 1], [], []>} : vector<16x512xbf16>, vector<512x256xbf16>, vector<16x256xf32> -> vector<16x256xf32>
    %c0_9 = arith.constant 0 : index
    %c0_10 = arith.constant 0 : index
    %11 = vector.load %arg5[%c0_9, %c0_10] : memref<1x256xf32, #tpu.memory_space<vmem>>, vector<1x256xf32>
    %12 = vector.broadcast %11 : vector<1x256xf32> to vector<16x256xf32>
    %13 = arith.addf %10, %12 : vector<16x256xf32>
    %cst_11 = arith.constant 0.000000e+00 : f32
    %14 = vector.broadcast %cst_11 : f32 to vector<16x256xf32>
    %15 = arith.maximumf %13, %14 : vector<16x256xf32>
    %16 = arith.truncf %15 : vector<16x256xf32> to vector<16x256xbf16>
    %c0_12 = arith.constant 0 : index
    %c0_13 = arith.constant 0 : index
    %17 = vector.load %arg6[%c0_12, %c0_13] : memref<256x128xbf16, #tpu.memory_space<vmem>>, vector<256x128xbf16>
    %cst_14 = arith.constant dense<0.000000e+00> : vector<16x128xf32>
    %18 = tpu.matmul %16, %17, %cst_14 {dimension_numbers = #tpu.dot_dimension_numbers<[1], [0], [0], [1], [0, 0, 1, 1], [], []>} : vector<16x256xbf16>, vector<256x128xbf16>, vector<16x128xf32> -> vector<16x128xf32>
    %c0_15 = arith.constant 0 : index
    %c0_16 = arith.constant 0 : index
    %19 = vector.load %arg7[%c0_15, %c0_16] : memref<1x128xf32, #tpu.memory_space<vmem>>, vector<1x128xf32>
    %20 = vector.broadcast %19 : vector<1x128xf32> to vector<16x128xf32>
    %21 = arith.addf %18, %20 : vector<16x128xf32>
    %cst_17 = arith.constant 0.000000e+00 : f32
    %22 = vector.broadcast %cst_17 : f32 to vector<16x128xf32>
    %23 = arith.maximumf %21, %22 : vector<16x128xf32>
    %24 = arith.truncf %23 : vector<16x128xf32> to vector<16x128xbf16>
    %c0_18 = arith.constant 0 : index
    %c0_19 = arith.constant 0 : index
    %25 = vector.load %arg8[%c0_18, %c0_19] : memref<128x128xbf16, #tpu.memory_space<vmem>>, vector<128x128xbf16>
    %cst_20 = arith.constant dense<0.000000e+00> : vector<16x128xf32>
    %26 = tpu.matmul %24, %25, %cst_20 {dimension_numbers = #tpu.dot_dimension_numbers<[1], [0], [0], [1], [0, 0, 1, 1], [], []>} : vector<16x128xbf16>, vector<128x128xbf16>, vector<16x128xf32> -> vector<16x128xf32>
    %c0_21 = arith.constant 0 : index
    %c0_22 = arith.constant 0 : index
    %27 = vector.load %arg9[%c0_21, %c0_22] : memref<1x128xf32, #tpu.memory_space<vmem>>, vector<1x128xf32>
    %28 = vector.broadcast %27 : vector<1x128xf32> to vector<16x128xf32>
    %29 = arith.addf %26, %28 : vector<16x128xf32>
    %cst_23 = arith.constant 0.000000e+00 : f32
    %30 = vector.broadcast %cst_23 : f32 to vector<16x128xf32>
    %31 = arith.maximumf %29, %30 : vector<16x128xf32>
    %32 = arith.truncf %31 : vector<16x128xf32> to vector<16x128xbf16>
    %c0_24 = arith.constant 0 : index
    %c0_25 = arith.constant 0 : index
    %33 = vector.load %arg10[%c0_24, %c0_25] : memref<128x128xbf16, #tpu.memory_space<vmem>>, vector<128x128xbf16>
    %cst_26 = arith.constant dense<0.000000e+00> : vector<16x128xf32>
    %34 = tpu.matmul %32, %33, %cst_26 {dimension_numbers = #tpu.dot_dimension_numbers<[1], [0], [0], [1], [0, 0, 1, 1], [], []>} : vector<16x128xbf16>, vector<128x128xbf16>, vector<16x128xf32> -> vector<16x128xf32>
    %c0_27 = arith.constant 0 : index
    %c0_28 = arith.constant 0 : index
    %35 = vector.load %arg11[%c0_27, %c0_28] : memref<1x128xf32, #tpu.memory_space<vmem>>, vector<1x128xf32>
    %36 = vector.broadcast %35 : vector<1x128xf32> to vector<16x128xf32>
    %37 = arith.addf %34, %36 : vector<16x128xf32>
    %38 = tpu.iota {dimensions = array<i32: 1>} : vector<16x128xi32>
    %c10_i32 = arith.constant 10 : i32
    %39 = vector.broadcast %c10_i32 : i32 to vector<16x128xi32>
    %40 = arith.cmpi slt, %38, %39 : vector<16x128xi32>
    %cst_29 = arith.constant -1.000000e+30 : f32
    %41 = vector.broadcast %cst_29 : f32 to vector<16x128xf32>
    %42 = arith.select %40, %37, %41 : vector<16x128xi1>, vector<16x128xf32>
    %cst_30 = arith.constant dense<0xFF800000> : vector<16xf32>
    %43 = vector.multi_reduction <maximumf>, %42, %cst_30 [1] : vector<16x128xf32> to vector<16xf32>
    %44 = vector.shape_cast %43 : vector<16xf32> to vector<16x1xf32>
    %45 = vector.broadcast %44 : vector<16x1xf32> to vector<16x128xf32>
    %46 = arith.subf %42, %45 : vector<16x128xf32>
    %47 = math.exp %46 : vector<16x128xf32>
    %cst_31 = arith.constant dense<0.000000e+00> : vector<16xf32>
    %48 = vector.multi_reduction <add>, %47, %cst_31 [1] : vector<16x128xf32> to vector<16xf32>
    %49 = vector.shape_cast %48 : vector<16xf32> to vector<16x1xf32>
    %50 = vector.broadcast %49 : vector<16x1xf32> to vector<16x128xf32>
    %51 = arith.divf %47, %50 : vector<16x128xf32>
    %c0_32 = arith.constant 0 : index
    %c0_33 = arith.constant 0 : index
    %52 = vector.load %arg12[%c0_32, %c0_33] : memref<16x128xf32, #tpu.memory_space<vmem>>, vector<16x128xf32>
    tpu.vector_store %arg12[%c0_32, %c0_33], %51 {strides = array<i32>} : memref<16x128xf32, #tpu.memory_space<vmem>>, vector<16x128xf32>,
    return
  }
  func.func @transform_0(%arg0: i32) -> (i32, i32) {
    %c0_i32 = arith.constant 0 : i32
    %c0_i32_0 = arith.constant 0 : i32
    return %arg0, %c0_i32 : i32, i32
  }
  func.func @transform_1(%arg0: i32) -> (i32, i32) {
    %c0_i32 = arith.constant 0 : i32
    %c0_i32_0 = arith.constant 0 : i32
    %c0_i32_1 = arith.constant 0 : i32
    return %c0_i32, %c0_i32_0 : i32, i32
  }
  func.func @transform_2(%arg0: i32) -> (i32, i32) {
    %c0_i32 = arith.constant 0 : i32
    %c0_i32_0 = arith.constant 0 : i32
    %c0_i32_1 = arith.constant 0 : i32
    return %c0_i32, %c0_i32_0 : i32, i32
  }
  func.func @transform_3(%arg0: i32) -> (i32, i32) {
    %c0_i32 = arith.constant 0 : i32
    %c0_i32_0 = arith.constant 0 : i32
    %c0_i32_1 = arith.constant 0 : i32
    return %c0_i32, %c0_i32_0 : i32, i32
  }
  func.func @transform_4(%arg0: i32) -> (i32, i32) {
    %c0_i32 = arith.constant 0 : i32
    %c0_i32_0 = arith.constant 0 : i32
    %c0_i32_1 = arith.constant 0 : i32
    return %c0_i32, %c0_i32_0 : i32, i32
  }
  func.func @transform_5(%arg0: i32) -> (i32, i32) {
    %c0_i32 = arith.constant 0 : i32
    %c0_i32_0 = arith.constant 0 : i32
    %c0_i32_1 = arith.constant 0 : i32
    return %c0_i32, %c0_i32_0 : i32, i32
  }
  func.func @transform_6(%arg0: i32) -> (i32, i32) {
    %c0_i32 = arith.constant 0 : i32
    %c0_i32_0 = arith.constant 0 : i32
    %c0_i32_1 = arith.constant 0 : i32
    return %c0_i32, %c0_i32_0 : i32, i32
  }
  func.func @transform_7(%arg0: i32) -> (i32, i32) {
    %c0_i32 = arith.constant 0 : i32
    %c0_i32_0 = arith.constant 0 : i32
    %c0_i32_1 = arith.constant 0 : i32
    return %c0_i32, %c0_i32_0 : i32, i32
  }
  func.func @transform_8(%arg0: i32) -> (i32, i32) {
    %c0_i32 = arith.constant 0 : i32
    %c0_i32_0 = arith.constant 0 : i32
    %c0_i32_1 = arith.constant 0 : i32
    return %c0_i32, %c0_i32_0 : i32, i32
  }
  func.func @transform_9(%arg0: i32) -> (i32, i32) {
    %c0_i32 = arith.constant 0 : i32
    %c0_i32_0 = arith.constant 0 : i32
    %c0_i32_1 = arith.constant 0 : i32
    return %c0_i32, %c0_i32_0 : i32, i32
  }
  func.func @transform_10(%arg0: i32) -> (i32, i32) {
    %c0_i32 = arith.constant 0 : i32
    %c0_i32_0 = arith.constant 0 : i32
    %c0_i32_1 = arith.constant 0 : i32
    return %c0_i32, %c0_i32_0 : i32, i32
  }
  func.func @transform_11(%arg0: i32) -> (i32, i32) {
    %c0_i32 = arith.constant 0 : i32
    %c0_i32_0 = arith.constant 0 : i32
    return %arg0, %c0_i32 : i32, i32
  }
}

</mosaic_0001>

<bundles_post_ra>
// kernel: tpu_custom_call.1
= control target key start
LH: loop header
LB: loop body
LE: loop exit
PB: predicated region body
PF: predicated region fallthrough
CT: control target
= control target key end

     0   :  { %16 = vsyncpa [#allocation3], 0  ;;  %s4179_s0 = inlined_call_operand.hbm [shape: bf16[16,896], index: 0, kind: input, shape index: {}]   ;;  %s4180_s1 = inlined_call_operand.hbm [shape: bf16[896,512], index: 1, kind: input, shape index: {}]   ;;  %s4181_s2 = inlined_call_operand.vmem [shape: f32[1,512], index: 2, kind: input, shape index: {}]   ;;  %s4182_s3 = inlined_call_operand.hbm [shape: bf16[512,256], index: 3, kind: input, shape index: {}]   ;;  %s4183_s4 = inlined_call_operand.vmem [shape: f32[1,256], index: 4, kind: input, shape index: {}]   ;;  %s4184_s5 = inlined_call_operand.hbm [shape: bf16[256,128], index: 5, kind: input, shape index: {}]   ;;  %s4185_s6 = inlined_call_operand.vmem [shape: f32[1,128], index: 6, kind: input, shape index: {}]   ;;  %s4186_s7 = inlined_call_operand.hbm [shape: bf16[128,128], index: 7, kind: input, shape index: {}]   ;;  %s4187_s8 = inlined_call_operand.vmem [shape: f32[1,128], index: 8, kind: input, shape index: {}]   ;;  %s4188_s9 = inlined_call_operand.hbm [shape: bf16[128,128], index: 9, kind: input, shape index: {}]   ;;  %s4189_s10 = inlined_call_operand.vmem [shape: f32[1,128], index: 10, kind: input, shape index: {}]   ;;  %s4190_s11 = inlined_call_operand.hbm [shape: f32[16,128], index: 11, kind: output, shape index: {}]  }
   0x1   :  { %17 = vsyncpa [#allocation6], 0 }
   0x2   :  { %18 = vsyncpa [#allocation9], 0 }
   0x3   :  { %19 = vsyncpa [#allocation12], 0 }
   0x4   :  { %20 = vsyncpa [#allocation4], 0  ;;  %s3941_s17 = smov [#allocation5]   ;;  %s3777_s21 = scalar_lea.hbm %s4180_s1, 28672 }
   0x5   :  { %s38_s18 = sshll.u32 %s3941_s17, 4  ;;  %p3778_p0 = scmp.ne.s32.totalorder %s4180_s1, %s3777_s21  ;;  %s39_s18 = int_to_ptr.vmem [resolvable:$true] %s38_s18 }
   0x6   :  { %p3781_p1 = scmp.lt.u32.totalorder %s3777_s21, %s4180_s1 }
   0x8   :  { %p3783_p2 = pnand %p3781_p1, %p3778_p0 }
   0xa   :  { %3786 = shalt.err (!%p3783_p2)
}
   0xb   :  { %s3787_s26 = scalar_lea.vmem %s39_s18, 28672  ;;  %p3792_p4 = scmp.lt.s32.totalorder %s39_s18, %s39_s18 }
   0xc   :  { %p3788_p3 = scmp.ne.s32.totalorder %s39_s18, %s3787_s26  ;;  %p3793_p5 = scmp.lt.s32.totalorder %s3787_s26, %s3787_s26 }
   0xe   :  { %p3794_p6 = por %p3793_p5, %p3792_p4 }
  0x10   :  { %p3795_p7 = pnand %p3794_p6, %p3788_p3 }
  0x12   :  { %3798 = shalt.err (!%p3795_p7)
}
  0x13   :  { %s3942_s27 = smov 256   ;;  %s3943_s28 = smov 16  }
  0x14   :  { %44 = dma.hbm_to_vmem [thread:$0]  %s4180_s1, 28672, %s39_s18, [#allocation6], %s3942_s27, %s3942_s27, %s3943_s28  }
  0x15   :  { %s3944_s12 = smov [#allocation8]   ;;  %s3799_s16 = scalar_lea.hbm %s4184_s5, 2048 }
  0x16   :  { %s66_s13 = sshll.u32 %s3944_s12, 4  ;;  %p3800_p8 = scmp.ne.s32.totalorder %s4184_s5, %s3799_s16  ;;  %s67_s13 = int_to_ptr.vmem [resolvable:$true] %s66_s13 }
  0x17   :  { %p3803_p9 = scmp.lt.u32.totalorder %s3799_s16, %s4184_s5 }
  0x19   :  { %p3805_p10 = pnand %p3803_p9, %p3800_p8 }
  0x1b   :  { %3808 = shalt.err (!%p3805_p10)
}
  0x1c   :  { %s3809_s22 = scalar_lea.vmem %s67_s13, 2048  ;;  %p3814_p12 = scmp.lt.s32.totalorder %s67_s13, %s67_s13 }
  0x1d   :  { %p3810_p11 = scmp.ne.s32.totalorder %s67_s13, %s3809_s22  ;;  %p3815_p13 = scmp.lt.s32.totalorder %s3809_s22, %s3809_s22 }
  0x1f   :  { %p3816_p0 = por %p3815_p13, %p3814_p12 }
  0x21   :  { %p3817_p1 = pnand %p3816_p0, %p3810_p11 }
  0x23   :  { %3820 = shalt.err (!%p3817_p1)
}
  0x24   :  { %s3945_s1 = smov 64   ;;  %s3946_s18 = smov 4  }
  0x25   :  { %72 = dma.hbm_to_vmem [thread:$0]  %s4184_s5, 2048, %s67_s13, [#allocation9], %s3945_s1, %s3945_s1, %s3946_s18  }
  0x26   :  { %s3947_s25 = smov [#allocation2]   ;;  %s3821_s29 = scalar_lea.hbm %s4179_s0, 896 }
  0x27   :  { %s26_s26 = sshll.u32 %s3947_s25, 4  ;;  %p3822_p2 = scmp.ne.s32.totalorder %s4179_s0, %s3821_s29  ;;  %s27_s26 = int_to_ptr.vmem [resolvable:$true] %s26_s26 }
  0x28   :  { %p3825_p3 = scmp.lt.u32.totalorder %s3821_s29, %s4179_s0 }
  0x2a   :  { %p3827_p4 = pnand %p3825_p3, %p3822_p2 }
  0x2c   :  { %3830 = shalt.err (!%p3827_p4)
}
  0x2d   :  { %s3831_s16 = scalar_lea.vmem %s27_s26, 896  ;;  %p3836_p6 = scmp.lt.s32.totalorder %s27_s26, %s27_s26 }
  0x2e   :  { %p3832_p5 = scmp.ne.s32.totalorder %s27_s26, %s3831_s16  ;;  %p3837_p7 = scmp.lt.s32.totalorder %s3831_s16, %s3831_s16 }
  0x30   :  { %p3838_p8 = por %p3837_p7, %p3836_p6 }
  0x32   :  { %p3839_p9 = pnand %p3838_p8, %p3832_p5 }
  0x34   :  { %3842 = shalt.err (!%p3839_p9)
}
  0x35   :  { %s3948_s5 = smov 448   ;;  %s3949_s13 = smov 28  }
  0x36   :  { %32 = dma.hbm_to_vmem [thread:$0]  %s4179_s0, 896, %s27_s26, [#allocation3], %s3948_s5, %s3948_s5, %s3949_s13  }
  0x37   :  { %s3950_s20 = smov [#allocation7]   ;;  %s3843_s24 = scalar_lea.hbm %s4182_s3, 8192 }
  0x38   :  { %s52_s21 = sshll.u32 %s3950_s20, 4  ;;  %p3844_p10 = scmp.ne.s32.totalorder %s4182_s3, %s3843_s24  ;;  %s53_s21 = int_to_ptr.vmem [resolvable:$true] %s52_s21 }
  0x39   :  { %p3847_p11 = scmp.lt.u32.totalorder %s3843_s24, %s4182_s3 }
  0x3b   :  { %p3849_p12 = pnand %p3847_p11, %p3844_p10 }
  0x3d   :  { %3852 = shalt.err (!%p3849_p12)
}
  0x3e   :  { %s3853_s30 = scalar_lea.vmem %s53_s21, 8192  ;;  %p3858_p0 = scmp.lt.s32.totalorder %s53_s21, %s53_s21 }
  0x3f   :  { %p3854_p13 = scmp.ne.s32.totalorder %s53_s21, %s3853_s30  ;;  %p3859_p1 = scmp.lt.s32.totalorder %s3853_s30, %s3853_s30 }
  0x41   :  { %p3860_p2 = por %p3859_p1, %p3858_p0 }
  0x43   :  { %p3861_p3 = pnand %p3860_p2, %p3854_p13 }
  0x45   :  { %3864 = shalt.err (!%p3861_p3)
}
  0x46   :  { %s3951_s0 = smov 128   ;;  %s3952_s26 = smov 8  }
  0x47   :  { %58 = dma.hbm_to_vmem [thread:$0]  %s4182_s3, 8192, %s53_s21, [#allocation6], %s3951_s0, %s3951_s0, %s3952_s26  }
  0x48   :  { %s3953_s15 = smov [#allocation10]   ;;  %s3954_s5 = smov [#allocation11]  }
  0x49   :  { %s80_s16 = sshll.u32 %s3953_s15, 4  ;;  %s94_s13 = sshll.u32 %s3954_s5, 4  ;;  %s81_s16 = int_to_ptr.vmem [resolvable:$true] %s80_s16  ;;  %s4073_s13 = int_to_ptr.vmem [resolvable:$true] %s94_s13 }
  0x4a   :  { %s3865_s20 = scalar_lea.hbm %s4186_s7, 1024 }
  0x4b   :  { %p3866_p4 = scmp.ne.s32.totalorder %s4186_s7, %s3865_s20  ;;  %p3869_p5 = scmp.lt.u32.totalorder %s3865_s20, %s4186_s7 }
  0x4d   :  { %p3871_p6 = pnand %p3869_p5, %p3866_p4 }
  0x4f   :  { %3874 = shalt.err (!%p3871_p6)
}
  0x50   :  { %s3875_s3 = scalar_lea.vmem %s81_s16, 1024  ;;  %p3880_p8 = scmp.lt.s32.totalorder %s81_s16, %s81_s16 }
  0x51   :  { %p3876_p7 = scmp.ne.s32.totalorder %s81_s16, %s3875_s3  ;;  %p3881_p9 = scmp.lt.s32.totalorder %s3875_s3, %s3875_s3 }
  0x53   :  { %p3882_p10 = por %p3881_p9, %p3880_p8 }
  0x55   :  { %p3883_p11 = pnand %p3882_p10, %p3876_p7 }
  0x57   :  { %3886 = shalt.err (!%p3883_p11)
}
  0x58   :  { %86 = dma.hbm_to_vmem [thread:$0]  %s4186_s7, 1024, %s81_s16, [#allocation9], %s3945_s1, %s3945_s1, %s3946_s18  }
  0x59   :  { %s3887_s30 = scalar_lea.hbm %s4188_s9, 1024 }
  0x5a   :  { %p3888_p12 = scmp.ne.s32.totalorder %s4188_s9, %s3887_s30  ;;  %p3891_p13 = scmp.lt.u32.totalorder %s3887_s30, %s4188_s9 }
  0x5c   :  { %p3893_p0 = pnand %p3891_p13, %p3888_p12 }
  0x5e   :  { %3896 = shalt.err (!%p3893_p0)
}
  0x5f   :  { %s3897_s17 = scalar_lea.vmem %s4073_s13, 1024  ;;  %p3902_p2 = scmp.lt.s32.totalorder %s4073_s13, %s4073_s13 }
  0x60   :  { %p3898_p1 = scmp.ne.s32.totalorder %s4073_s13, %s3897_s17  ;;  %p3903_p3 = scmp.lt.s32.totalorder %s3897_s17, %s3897_s17 }
  0x62   :  { %p3904_p4 = por %p3903_p3, %p3902_p2 }
  0x64   :  { %p3905_p5 = pnand %p3904_p4, %p3898_p1 }
  0x66   :  { %3908 = shalt.err (!%p3905_p5)
}
  0x67   :  { %100 = dma.hbm_to_vmem [thread:$0]  %s4188_s9, 1024, %s4073_s13, [#allocation12], %s3945_s1, %s3945_s1, %s3946_s18  }
  0x68   :  { %3931 = dma.done.wait [#allocation3], 896  }
  0x69   :  { %3932 = vsyncadd [#allocation3], 4294966400 }
  0x6a   :  { %3933 = dma.done.wait [#allocation6], 36864  }
  0x6b   :  { %3934 = vsyncadd [#allocation6], 4294930432 }
  0x6c   :  { %3935 = dma.done.wait [#allocation9], 3072  }
  0x6d   :  { %3936 = vsyncadd [#allocation9], 4294964224 }
  0x6e   :  { %3937 = dma.done.wait [#allocation12], 1024  }
  0x6f   :  { %3938 = vsyncadd [#allocation12], 4294966272  ;;  %v3295_v0 = vld [vmem:[#allocation5 + $0x4] ss:$16 sps:$4 sm:$0xff]   ;;  %v3297_v1 = vld [vmem:[#allocation5 + $0xc] ss:$16 sps:$4 sm:$0xff]  }
  0x70   :  { %1532 = vmatprep.subr.bf16.mxu0 %v3295_v0  ;;  %v3299_v2 = vld [vmem:[#allocation5] ss:$16 sps:$4 sm:$0xff]   ;;  %v3300_v3 = vld [vmem:[#allocation5 + $0x8] ss:$16 sps:$4 sm:$0xff]   ;;  %1704 = vmatprep.subr.bf16.mxu1 %v3297_v1  ;;  %v3301_v4 = vld [vmem:[#allocation5 + $0x24] ss:$16 sps:$4 sm:$0xff]  }
  0x71   :  { %1533 = vmatpush1.bf16.msra.mxu0 %v3299_v2  ;;  %1705 = vmatpush1.bf16.msra.mxu1 %v3300_v3  ;;  %v3303_v5 = vld [vmem:[#allocation5 + $0x2c] ss:$16 sps:$4 sm:$0xff]   ;;  %v3305_v6 = vld [vmem:[#allocation5 + $0x20] ss:$16 sps:$4 sm:$0xff]   ;;  %v3306_v7 = vld [vmem:[#allocation5 + $0x28] ss:$16 sps:$4 sm:$0xff]  }
  0x72   :  { %1534 = vmatprep.subr.bf16.mxu0 %v3301_v4  ;;  %1706 = vmatprep.subr.bf16.mxu1 %v3303_v5  ;;  %v3307_v8 = vld [vmem:[#allocation5 + $0x44] ss:$16 sps:$4 sm:$0xff]   ;;  %v3309_v9 = vld [vmem:[#allocation5 + $0x4c] ss:$16 sps:$4 sm:$0xff]   ;;  %v3311_v10 = vld [vmem:[#allocation5 + $0x40] ss:$16 sps:$4 sm:$0xff]  }
  0x73   :  { %v3312_v11 = vld [vmem:[#allocation5 + $0x48] ss:$16 sps:$4 sm:$0xff]   ;;  %v3313_v12 = vld [vmem:[#allocation5 + $0x64] ss:$16 sps:$4 sm:$0xff]   ;;  %v3315_v13 = vld [vmem:[#allocation5 + $0x6c] ss:$16 sps:$4 sm:$0xff]  }
  0x74   :  { %v3317_v14 = vld [vmem:[#allocation5 + $0x60] ss:$16 sps:$4 sm:$0xff]   ;;  %v3318_v15 = vld [vmem:[#allocation5 + $0x68] ss:$16 sps:$4 sm:$0xff]   ;;  %v3319_v16 = vld [vmem:[#allocation5 + $0x84] ss:$16 sps:$4 sm:$0xff]  }
  0x75   :  { %1535 = vmatpush1.bf16.msra.mxu0 %v3305_v6  ;;  %1707 = vmatpush1.bf16.msra.mxu1 %v3306_v7  ;;  %v3321_v17 = vld [vmem:[#allocation5 + $0x8c] ss:$16 sps:$4 sm:$0xff]   ;;  %v3323_v18 = vld [vmem:[#allocation5 + $0x80] ss:$16 sps:$4 sm:$0xff]   ;;  %v3324_v19 = vld [vmem:[#allocation5 + $0x88] ss:$16 sps:$4 sm:$0xff]  }
  0x76   :  { %1536 = vmatprep.subr.bf16.mxu0 %v3307_v8  ;;  %1708 = vmatprep.subr.bf16.mxu1 %v3309_v9  ;;  %v3325_v20 = vld [vmem:[#allocation5 + $0xa4] ss:$16 sps:$4 sm:$0xff]   ;;  %v3327_v21 = vld [vmem:[#allocation5 + $0xac] ss:$16 sps:$4 sm:$0xff]   ;;  %v3329_v22 = vld [vmem:[#allocation5 + $0xa0] ss:$16 sps:$4 sm:$0xff]  }
  0x77   :  { %v3330_v23 = vld [vmem:[#allocation5 + $0xa8] ss:$16 sps:$4 sm:$0xff]   ;;  %v3331_v24 = vld [vmem:[#allocation5 + $0xc4] ss:$16 sps:$4 sm:$0xff]   ;;  %v3333_v25 = vld [vmem:[#allocation5 + $0xcc] ss:$16 sps:$4 sm:$0xff]  }
  0x78   :  { %v3335_v26 = vld [vmem:[#allocation5 + $0xc0] ss:$16 sps:$4 sm:$0xff]   ;;  %v3336_v27 = vld [vmem:[#allocation5 + $0xc8] ss:$16 sps:$4 sm:$0xff]   ;;  %v3337_v28 = vld [vmem:[#allocation5 + $0xe4] ss:$16 sps:$4 sm:$0xff]  }
  0x79   :  { %1537 = vmatpush1.bf16.msra.mxu0 %v3311_v10  ;;  %1709 = vmatpush1.bf16.msra.mxu1 %v3312_v11  ;;  %v3339_v29 = vld [vmem:[#allocation5 + $0xec] ss:$16 sps:$4 sm:$0xff]   ;;  %v3341_v30 = vld [vmem:[#allocation5 + $0xe0] ss:$16 sps:$4 sm:$0xff]   ;;  %v3342_v31 = vld [vmem:[#allocation5 + $0xe8] ss:$16 sps:$4 sm:$0xff]  }
  0x7a   :  { %1538 = vmatprep.subr.bf16.mxu0 %v3313_v12  ;;  %1710 = vmatprep.subr.bf16.mxu1 %v3315_v13  ;;  %v3343_v32 = vld [vmem:[#allocation5 + $0x104] ss:$16 sps:$4 sm:$0xff]   ;;  %v3345_v33 = vld [vmem:[#allocation5 + $0x10c] ss:$16 sps:$4 sm:$0xff]   ;;  %v3347_v34 = vld [vmem:[#allocation5 + $0x100] ss:$16 sps:$4 sm:$0xff]  }
  0x7b   :  { %v3348_v35 = vld [vmem:[#allocation5 + $0x108] ss:$16 sps:$4 sm:$0xff]   ;;  %v3349_v36 = vld [vmem:[#allocation5 + $0x124] ss:$16 sps:$4 sm:$0xff]   ;;  %v3351_v37 = vld [vmem:[#allocation5 + $0x12c] ss:$16 sps:$4 sm:$0xff]  }
  0x7c   :  { %v3353_v38 = vld [vmem:[#allocation5 + $0x120] ss:$16 sps:$4 sm:$0xff]   ;;  %v3354_v39 = vld [vmem:[#allocation5 + $0x128] ss:$16 sps:$4 sm:$0xff]   ;;  %v3355_v40 = vld [vmem:[#allocation5 + $0x144] ss:$16 sps:$4 sm:$0xff]  }
  0x7d   :  { %1539 = vmatpush1.bf16.msra.mxu0 %v3317_v14  ;;  %1711 = vmatpush1.bf16.msra.mxu1 %v3318_v15  ;;  %v3357_v41 = vld [vmem:[#allocation5 + $0x14c] ss:$16 sps:$4 sm:$0xff]   ;;  %v3359_v42 = vld [vmem:[#allocation5 + $0x140] ss:$16 sps:$4 sm:$0xff]   ;;  %v3360_v43 = vld [vmem:[#allocation5 + $0x148] ss:$16 sps:$4 sm:$0xff]  }
  0x7e   :  { %1540 = vmatprep.subr.bf16.mxu0 %v3319_v16  ;;  %1712 = vmatprep.subr.bf16.mxu1 %v3321_v17  ;;  %v3361_v44 = vld [vmem:[#allocation5 + $0x164] ss:$16 sps:$4 sm:$0xff]   ;;  %v3363_v45 = vld [vmem:[#allocation5 + $0x16c] ss:$16 sps:$4 sm:$0xff]   ;;  %v3365_v46 = vld [vmem:[#allocation5 + $0x160] ss:$16 sps:$4 sm:$0xff]  }
  0x7f   :  { %v3366_v47 = vld [vmem:[#allocation5 + $0x168] ss:$16 sps:$4 sm:$0xff]   ;;  %v3367_v49 = vld [vmem:[#allocation5 + $0x184] ss:$16 sps:$4 sm:$0xff]   ;;  %v3369_v50 = vld [vmem:[#allocation5 + $0x18c] ss:$16 sps:$4 sm:$0xff]  }
  0x80   :  { %v3393_v48 = vld [vmem:[#allocation2 + $0x4] ss:$28 sps:$4 sm:$0xff]   ;;  %v3371_v51 = vld [vmem:[#allocation5 + $0x180] ss:$16 sps:$4 sm:$0xff]   ;;  %v3373_v53 = vld [vmem:[#allocation5 + $0x1a4] ss:$16 sps:$4 sm:$0xff]  }
  0x81   :  { %1541 = vmatpush1.bf16.msra.mxu0 %v3323_v18  ;;  %1713 = vmatpush1.bf16.msra.mxu1 %v3324_v19  ;;  %v3372_v52 = vld [vmem:[#allocation5 + $0x188] ss:$16 sps:$4 sm:$0xff]   ;;  %v3375_v54 = vld [vmem:[#allocation5 + $0x1ac] ss:$16 sps:$4 sm:$0xff]   ;;  %v3377_v55 = vld [vmem:[#allocation5 + $0x1a0] ss:$16 sps:$4 sm:$0xff]  }
  0x82   :  { %1542 = vmatprep.subr.bf16.mxu0 %v3325_v20  ;;  %1714 = vmatprep.subr.bf16.mxu1 %v3327_v21  ;;  %v3378_v56 = vld [vmem:[#allocation5 + $0x1a8] ss:$16 sps:$4 sm:$0xff]   ;;  %v3379_v57 = vld [vmem:[#allocation5 + $0x1c4] ss:$16 sps:$4 sm:$0xff]   ;;  %v3381_v58 = vld [vmem:[#allocation5 + $0x1cc] ss:$16 sps:$4 sm:$0xff]  }
  0x83   :  { %1564 = vmatprep.mubr.bf16.mxu0 %v3393_v48  ;;  %1736 = vmatprep.mubr.bf16.mxu1 %v3393_v48  ;;  %v3383_v59 = vld [vmem:[#allocation5 + $0x1c0] ss:$16 sps:$4 sm:$0xff]   ;;  %v3384_v60 = vld [vmem:[#allocation5 + $0x1c8] ss:$16 sps:$4 sm:$0xff]   ;;  %v3385_v61 = vld [vmem:[#allocation5 + $0x1e4] ss:$16 sps:$4 sm:$0xff]  }
  0x84   :  { %v3387_v62 = vld [vmem:[#allocation5 + $0x1ec] ss:$16 sps:$4 sm:$0xff]   ;;  %v3389_v63 = vld [vmem:[#allocation5 + $0x1e0] ss:$16 sps:$4 sm:$0xff]   ;;  %v3390_v0 = vld [vmem:[#allocation5 + $0x1e8] ss:$16 sps:$4 sm:$0xff]  }
  0x85   :  { %1543 = vmatpush1.bf16.msra.mxu0 %v3329_v22  ;;  %1715 = vmatpush1.bf16.msra.mxu1 %v3330_v23  ;;  %v3396_v1 = vld [vmem:[#allocation5 + $0x204] ss:$16 sps:$4 sm:$0xff]   ;;  %v3399_v2 = vld [vmem:[#allocation5 + $0x20c] ss:$16 sps:$4 sm:$0xff]   ;;  %v3394_v4 = vld [vmem:[#allocation5 + $0x200] ss:$16 sps:$4 sm:$0xff]  }
  0x86   :  { %1544 = vmatprep.subr.bf16.mxu0 %v3331_v24  ;;  %1716 = vmatprep.subr.bf16.mxu1 %v3333_v25  ;;  %v3391_v3 = vld [vmem:[#allocation2] ss:$28 sps:$4 sm:$0xff]   ;;  %v3405_v7 = vld [vmem:[#allocation5 + $0x22c] ss:$16 sps:$4 sm:$0xff]   ;;  %v3400_v8 = vld [vmem:[#allocation5 + $0x220] ss:$16 sps:$4 sm:$0xff]  }
  0x87   :  { %v3397_v5 = vld [vmem:[#allocation5 + $0x208] ss:$16 sps:$4 sm:$0xff]   ;;  %v3402_v6 = vld [vmem:[#allocation5 + $0x224] ss:$16 sps:$4 sm:$0xff]   ;;  %v3411_v11 = vld [vmem:[#allocation5 + $0x24c] ss:$16 sps:$4 sm:$0xff]  }
  0x88   :  { %v3403_v9 = vld [vmem:[#allocation5 + $0x228] ss:$16 sps:$4 sm:$0xff]   ;;  %v3408_v10 = vld [vmem:[#allocation5 + $0x244] ss:$16 sps:$4 sm:$0xff]   ;;  %v3406_v12 = vld [vmem:[#allocation5 + $0x240] ss:$16 sps:$4 sm:$0xff]  }
  0x89   :  { %1545 = vmatpush1.bf16.msra.mxu0 %v3335_v26  ;;  %1717 = vmatpush1.bf16.msra.mxu1 %v3336_v27  ;;  %v3409_v13 = vld [vmem:[#allocation5 + $0x248] ss:$16 sps:$4 sm:$0xff]   ;;  %v3414_v14 = vld [vmem:[#allocation5 + $0x264] ss:$16 sps:$4 sm:$0xff]   ;;  %v3417_v15 = vld [vmem:[#allocation5 + $0x26c] ss:$16 sps:$4 sm:$0xff]  }
  0x8a   :  { %1546 = vmatprep.subr.bf16.mxu0 %v3337_v28  ;;  %1718 = vmatprep.subr.bf16.mxu1 %v3339_v29  ;;  %v3412_v16 = vld [vmem:[#allocation5 + $0x260] ss:$16 sps:$4 sm:$0xff]   ;;  %v3415_v17 = vld [vmem:[#allocation5 + $0x268] ss:$16 sps:$4 sm:$0xff]   ;;  %v3420_v18 = vld [vmem:[#allocation5 + $0x284] ss:$16 sps:$4 sm:$0xff]  }
  0x8b   :  { %v3423_v19 = vld [vmem:[#allocation5 + $0x28c] ss:$16 sps:$4 sm:$0xff]   ;;  %v3418_v20 = vld [vmem:[#allocation5 + $0x280] ss:$16 sps:$4 sm:$0xff]   ;;  %v3421_v21 = vld [vmem:[#allocation5 + $0x288] ss:$16 sps:$4 sm:$0xff]  }
  0x8c   :  { %v3426_v22 = vld [vmem:[#allocation5 + $0x2a4] ss:$16 sps:$4 sm:$0xff]   ;;  %v3429_v23 = vld [vmem:[#allocation5 + $0x2ac] ss:$16 sps:$4 sm:$0xff]   ;;  %v3424_v24 = vld [vmem:[#allocation5 + $0x2a0] ss:$16 sps:$4 sm:$0xff]  }
  0x8d   :  { %1547 = vmatpush1.bf16.msra.mxu0 %v3341_v30  ;;  %1719 = vmatpush1.bf16.msra.mxu1 %v3342_v31  ;;  %v3427_v25 = vld [vmem:[#allocation5 + $0x2a8] ss:$16 sps:$4 sm:$0xff]   ;;  %v3432_v26 = vld [vmem:[#allocation5 + $0x2c4] ss:$16 sps:$4 sm:$0xff]   ;;  %v3435_v27 = vld [vmem:[#allocation5 + $0x2cc] ss:$16 sps:$4 sm:$0xff]  }
  0x8e   :  { %1548 = vmatprep.subr.bf16.mxu0 %v3343_v32  ;;  %1720 = vmatprep.subr.bf16.mxu1 %v3345_v33  ;;  %v3430_v28 = vld [vmem:[#allocation5 + $0x2c0] ss:$16 sps:$4 sm:$0xff]   ;;  %v3433_v29 = vld [vmem:[#allocation5 + $0x2c8] ss:$16 sps:$4 sm:$0xff]   ;;  %v3438_v31 = vld [vmem:[#allocation5 + $0x2e4] ss:$16 sps:$4 sm:$0xff]  }
  0x8f   :  { %v3492_v30 = vld [vmem:[#allocation2 + $0xc] ss:$28 sps:$4 sm:$0xff]   ;;  %v3441_v32 = vld [vmem:[#allocation5 + $0x2ec] ss:$16 sps:$4 sm:$0xff]   ;;  %vm3957_vm0 = vmmov 0  }
  0x90   :  { %v3436_v33 = vld [vmem:[#allocation5 + $0x2e0] ss:$16 sps:$4 sm:$0xff]   ;;  %v3465_v48 = vld [vmem:[#allocation5 + $0x36c] ss:$16 sps:$4 sm:$0xff]  }
  0x91   :  { %1549 = vmatpush1.bf16.msra.mxu0 %v3347_v34  ;;  %1721 = vmatpush1.bf16.msra.mxu1 %v3348_v35  ;;  %v3439_v34 = vld [vmem:[#allocation5 + $0x2e8] ss:$16 sps:$4 sm:$0xff]   ;;  %v3444_v35 = vld [vmem:[#allocation5 + $0x304] ss:$16 sps:$4 sm:$0xff]  }
  0x92   :  { %1550 = vmatprep.subr.bf16.mxu0 %v3349_v36  ;;  %1722 = vmatprep.subr.bf16.mxu1 %v3351_v37  ;;  %v3447_v36 = vld [vmem:[#allocation5 + $0x30c] ss:$16 sps:$4 sm:$0xff]   ;;  %v3442_v37 = vld [vmem:[#allocation5 + $0x300] ss:$16 sps:$4 sm:$0xff]  }
  0x95   :  { %1551 = vmatpush1.bf16.msra.mxu0 %v3353_v38  ;;  %1723 = vmatpush1.bf16.msra.mxu1 %v3354_v39  ;;  %v3445_v38 = vld [vmem:[#allocation5 + $0x308] ss:$16 sps:$4 sm:$0xff]   ;;  %v3450_v39 = vld [vmem:[#allocation5 + $0x324] ss:$16 sps:$4 sm:$0xff]  }
  0x96   :  { %1552 = vmatprep.subr.bf16.mxu0 %v3355_v40  ;;  %1724 = vmatprep.subr.bf16.mxu1 %v3357_v41  ;;  %v3453_v40 = vld [vmem:[#allocation5 + $0x32c] ss:$16 sps:$4 sm:$0xff]   ;;  %v3448_v41 = vld [vmem:[#allocation5 + $0x320] ss:$16 sps:$4 sm:$0xff]  }
  0x99   :  { %1553 = vmatpush1.bf16.msra.mxu0 %v3359_v42  ;;  %1725 = vmatpush1.bf16.msra.mxu1 %v3360_v43  ;;  %v3451_v42 = vld [vmem:[#allocation5 + $0x328] ss:$16 sps:$4 sm:$0xff]   ;;  %v3456_v43 = vld [vmem:[#allocation5 + $0x344] ss:$16 sps:$4 sm:$0xff]  }
  0x9a   :  { %1554 = vmatprep.subr.bf16.mxu0 %v3361_v44  ;;  %1726 = vmatprep.subr.bf16.mxu1 %v3363_v45  ;;  %v3459_v44 = vld [vmem:[#allocation5 + $0x34c] ss:$16 sps:$4 sm:$0xff]   ;;  %v3454_v45 = vld [vmem:[#allocation5 + $0x340] ss:$16 sps:$4 sm:$0xff]  }
  0x9d   :  { %1555 = vmatpush1.bf16.msra.mxu0 %v3365_v46  ;;  %1727 = vmatpush1.bf16.msra.mxu1 %v3366_v47  ;;  %v3457_v46 = vld [vmem:[#allocation5 + $0x348] ss:$16 sps:$4 sm:$0xff]   ;;  %v3462_v47 = vld [vmem:[#allocation5 + $0x364] ss:$16 sps:$4 sm:$0xff]  }
  0x9e   :  { %1556 = vmatprep.subr.bf16.mxu0 %v3367_v49  ;;  %1728 = vmatprep.subr.bf16.mxu1 %v3369_v50  ;;  %v3460_v49 = vld [vmem:[#allocation5 + $0x360] ss:$16 sps:$4 sm:$0xff]   ;;  %v3463_v50 = vld [vmem:[#allocation5 + $0x368] ss:$16 sps:$4 sm:$0xff]  }
  0xa1   :  { %1557 = vmatpush1.bf16.msra.mxu0 %v3371_v51  ;;  %1729 = vmatpush1.bf16.msra.mxu1 %v3372_v52  ;;  %v3468_v51 = vld [vmem:[#allocation5 + $0x384] ss:$16 sps:$4 sm:$0xff]   ;;  %v3471_v52 = vld [vmem:[#allocation5 + $0x38c] ss:$16 sps:$4 sm:$0xff]  }
  0xa2   :  { %1558 = vmatprep.subr.bf16.mxu0 %v3373_v53  ;;  %1730 = vmatprep.subr.bf16.mxu1 %v3375_v54  ;;  %v3466_v53 = vld [vmem:[#allocation5 + $0x380] ss:$16 sps:$4 sm:$0xff]   ;;  %v3469_v54 = vld [vmem:[#allocation5 + $0x388] ss:$16 sps:$4 sm:$0xff]  }
  0xa5   :  { %1559 = vmatpush1.bf16.msra.mxu0 %v3377_v55  ;;  %1731 = vmatpush1.bf16.msra.mxu1 %v3378_v56  ;;  %v3474_v55 = vld [vmem:[#allocation5 + $0x3a4] ss:$16 sps:$4 sm:$0xff]   ;;  %v3477_v56 = vld [vmem:[#allocation5 + $0x3ac] ss:$16 sps:$4 sm:$0xff]  }
  0xa6   :  { %1560 = vmatprep.subr.bf16.mxu0 %v3379_v57  ;;  %1732 = vmatprep.subr.bf16.mxu1 %v3381_v58  ;;  %v3472_v57 = vld [vmem:[#allocation5 + $0x3a0] ss:$16 sps:$4 sm:$0xff]   ;;  %v3475_v58 = vld [vmem:[#allocation5 + $0x3a8] ss:$16 sps:$4 sm:$0xff]  }
  0xa9   :  { %1561 = vmatpush1.bf16.msra.mxu0 %v3383_v59  ;;  %1733 = vmatpush1.bf16.msra.mxu1 %v3384_v60  ;;  %v3480_v59 = vld [vmem:[#allocation5 + $0x3c4] ss:$16 sps:$4 sm:$0xff]   ;;  %v3483_v60 = vld [vmem:[#allocation5 + $0x3cc] ss:$16 sps:$4 sm:$0xff]  }
  0xaa   :  { %1562 = vmatprep.subr.bf16.mxu0 %v3385_v61  ;;  %1734 = vmatprep.subr.bf16.mxu1 %v3387_v62  ;;  %v3478_v61 = vld [vmem:[#allocation5 + $0x3c0] ss:$16 sps:$4 sm:$0xff]   ;;  %v3481_v62 = vld [vmem:[#allocation5 + $0x3c8] ss:$16 sps:$4 sm:$0xff]  }
  0xad   :  { %1563 = vmatpush1.bf16.msra.mxu0 %v3389_v63  ;;  %1735 = vmatpush1.bf16.msra.mxu1 %v3390_v0  ;;  %v3486_v63 = vld [vmem:[#allocation5 + $0x3e4] ss:$16 sps:$4 sm:$0xff]   ;;  %v3489_v0 = vld [vmem:[#allocation5 + $0x3ec] ss:$16 sps:$4 sm:$0xff]  }
  0xae   :  { %1575 = vmatprep.subr.bf16.mxu0 %v3396_v1  ;;  %1747 = vmatprep.subr.bf16.mxu1 %v3399_v2  ;;  %v3484_v1 = vld [vmem:[#allocation5 + $0x3e0] ss:$16 sps:$4 sm:$0xff]   ;;  %v3487_v2 = vld [vmem:[#allocation5 + $0x3e8] ss:$16 sps:$4 sm:$0xff]  }
  0xb0   :  { %1565 = vmatmul.mubr.bf16.vlgmr.msra.gmra.mrb[0].mxu0 %v3391_v3  ;;  %1737 = vmatmul.mubr.bf16.vlgmr.msra.gmra.mrb[0].mxu1 %v3391_v3  ;;  %v3495_v3 = vld [vmem:[#allocation5 + $0x404] ss:$16 sps:$4 sm:$0xff]  }
  0xb1   :  { %1576 = vmatpush1.bf16.msra.mxu0 %v3394_v4  ;;  %1748 = vmatpush1.bf16.msra.mxu1 %v3397_v5  ;;  %v3498_v4 = vld [vmem:[#allocation5 + $0x40c] ss:$16 sps:$4 sm:$0xff]  }
  0xb2   :  { %1577 = vmatprep.subr.bf16.mxu0 %v3402_v6  ;;  %1749 = vmatprep.subr.bf16.mxu1 %v3405_v7  ;;  %v3490_v5 = vld [vmem:[#allocation2 + $0x8] ss:$28 sps:$4 sm:$0xff]   ;;  %v3496_v7 = vld [vmem:[#allocation5 + $0x408] ss:$16 sps:$4 sm:$0xff]  }
  0xb3   :  { %1607 = vmatprep.mubr.bf16.mxu0 %v3492_v30  ;;  %1779 = vmatprep.mubr.bf16.mxu1 %v3492_v30  ;;  %v3493_v6 = vld [vmem:[#allocation5 + $0x400] ss:$16 sps:$4 sm:$0xff]   ;;  %v3534_v30 = vld [vmem:[#allocation5 + $0x4cc] ss:$16 sps:$4 sm:$0xff]  }
  0xb5   :  { %1578 = vmatpush1.bf16.msra.mxu0 %v3400_v8  ;;  %1750 = vmatpush1.bf16.msra.mxu1 %v3403_v9  ;;  %v3501_v8 = vld [vmem:[#allocation5 + $0x424] ss:$16 sps:$4 sm:$0xff]   ;;  %v3504_v9 = vld [vmem:[#allocation5 + $0x42c] ss:$16 sps:$4 sm:$0xff]  }
  0xb6   :  { %1579 = vmatprep.subr.bf16.mxu0 %v3408_v10  ;;  %1751 = vmatprep.subr.bf16.mxu1 %v3411_v11  ;;  %v3499_v10 = vld [vmem:[#allocation5 + $0x420] ss:$16 sps:$4 sm:$0xff]   ;;  %v3502_v11 = vld [vmem:[#allocation5 + $0x428] ss:$16 sps:$4 sm:$0xff]  }
  0xb9   :  { %1580 = vmatpush1.bf16.msra.mxu0 %v3406_v12  ;;  %1752 = vmatpush1.bf16.msra.mxu1 %v3409_v13  ;;  %v3591_v12 = vld [vmem:[#allocation2 + $0x14] ss:$28 sps:$4 sm:$0xff]   ;;  %v3507_v13 = vld [vmem:[#allocation5 + $0x444] ss:$16 sps:$4 sm:$0xff]  }
  0xba   :  { %1581 = vmatprep.subr.bf16.mxu0 %v3414_v14  ;;  %1753 = vmatprep.subr.bf16.mxu1 %v3417_v15  ;;  %v3510_v14 = vld [vmem:[#allocation5 + $0x44c] ss:$16 sps:$4 sm:$0xff]   ;;  %v3505_v15 = vld [vmem:[#allocation5 + $0x440] ss:$16 sps:$4 sm:$0xff]  }
  0xbd   :  { %1582 = vmatpush1.bf16.msra.mxu0 %v3412_v16  ;;  %1754 = vmatpush1.bf16.msra.mxu1 %v3415_v17  ;;  %v3508_v16 = vld [vmem:[#allocation5 + $0x448] ss:$16 sps:$4 sm:$0xff]   ;;  %v3513_v17 = vld [vmem:[#allocation5 + $0x464] ss:$16 sps:$4 sm:$0xff]  }
  0xbe   :  { %1583 = vmatprep.subr.bf16.mxu0 %v3420_v18  ;;  %1755 = vmatprep.subr.bf16.mxu1 %v3423_v19  ;;  %v3516_v18 = vld [vmem:[#allocation5 + $0x46c] ss:$16 sps:$4 sm:$0xff]   ;;  %v3511_v19 = vld [vmem:[#allocation5 + $0x460] ss:$16 sps:$4 sm:$0xff]  }
  0xc1   :  { %1584 = vmatpush1.bf16.msra.mxu0 %v3418_v20  ;;  %1756 = vmatpush1.bf16.msra.mxu1 %v3421_v21  ;;  %v3514_v20 = vld [vmem:[#allocation5 + $0x468] ss:$16 sps:$4 sm:$0xff]   ;;  %v3519_v21 = vld [vmem:[#allocation5 + $0x484] ss:$16 sps:$4 sm:$0xff]  }
  0xc2   :  { %1585 = vmatprep.subr.bf16.mxu0 %v3426_v22  ;;  %1757 = vmatprep.subr.bf16.mxu1 %v3429_v23  ;;  %v3522_v22 = vld [vmem:[#allocation5 + $0x48c] ss:$16 sps:$4 sm:$0xff]   ;;  %v3517_v23 = vld [vmem:[#allocation5 + $0x480] ss:$16 sps:$4 sm:$0xff]  }
  0xc5   :  { %1586 = vmatpush1.bf16.msra.mxu0 %v3424_v24  ;;  %1758 = vmatpush1.bf16.msra.mxu1 %v3427_v25  ;;  %v3520_v24 = vld [vmem:[#allocation5 + $0x488] ss:$16 sps:$4 sm:$0xff]   ;;  %v3525_v25 = vld [vmem:[#allocation5 + $0x4a4] ss:$16 sps:$4 sm:$0xff]  }
  0xc6   :  { %1587 = vmatprep.subr.bf16.mxu0 %v3432_v26  ;;  %1759 = vmatprep.subr.bf16.mxu1 %v3435_v27  ;;  %v3528_v26 = vld [vmem:[#allocation5 + $0x4ac] ss:$16 sps:$4 sm:$0xff]   ;;  %v3523_v27 = vld [vmem:[#allocation5 + $0x4a0] ss:$16 sps:$4 sm:$0xff]  }
  0xc9   :  { %1588 = vmatpush1.bf16.msra.mxu0 %v3430_v28  ;;  %1760 = vmatpush1.bf16.msra.mxu1 %v3433_v29  ;;  %v3526_v28 = vld [vmem:[#allocation5 + $0x4a8] ss:$16 sps:$4 sm:$0xff]   ;;  %v3531_v29 = vld [vmem:[#allocation5 + $0x4c4] ss:$16 sps:$4 sm:$0xff]  }
  0xca   :  { %1589 = vmatprep.subr.bf16.mxu0 %v3438_v31  ;;  %1761 = vmatprep.subr.bf16.mxu1 %v3441_v32  ;;  %v3529_v31 = vld [vmem:[#allocation5 + $0x4c0] ss:$16 sps:$4 sm:$0xff]   ;;  %v3532_v32 = vld [vmem:[#allocation5 + $0x4c8] ss:$16 sps:$4 sm:$0xff]  }
  0xcd   :  { %1590 = vmatpush1.bf16.msra.mxu0 %v3436_v33  ;;  %1762 = vmatpush1.bf16.msra.mxu1 %v3439_v34  ;;  %v3537_v33 = vld [vmem:[#allocation5 + $0x4e4] ss:$16 sps:$4 sm:$0xff]   ;;  %v3540_v34 = vld [vmem:[#allocation5 + $0x4ec] ss:$16 sps:$4 sm:$0xff]  }
  0xce   :  { %1591 = vmatprep.subr.bf16.mxu0 %v3444_v35  ;;  %1763 = vmatprep.subr.bf16.mxu1 %v3447_v36  ;;  %v3535_v35 = vld [vmem:[#allocation5 + $0x4e0] ss:$16 sps:$4 sm:$0xff]   ;;  %v3538_v36 = vld [vmem:[#allocation5 + $0x4e8] ss:$16 sps:$4 sm:$0xff]  }
  0xd1   :  { %1592 = vmatpush1.bf16.msra.mxu0 %v3442_v37  ;;  %1764 = vmatpush1.bf16.msra.mxu1 %v3445_v38  ;;  %v3543_v37 = vld [vmem:[#allocation5 + $0x504] ss:$16 sps:$4 sm:$0xff]   ;;  %v3546_v38 = vld [vmem:[#allocation5 + $0x50c] ss:$16 sps:$4 sm:$0xff]  }
  0xd2   :  { %1593 = vmatprep.subr.bf16.mxu0 %v3450_v39  ;;  %1765 = vmatprep.subr.bf16.mxu1 %v3453_v40  ;;  %v3541_v39 = vld [vmem:[#allocation5 + $0x500] ss:$16 sps:$4 sm:$0xff]   ;;  %v3544_v40 = vld [vmem:[#allocation5 + $0x508] ss:$16 sps:$4 sm:$0xff]  }
  0xd5   :  { %1594 = vmatpush1.bf16.msra.mxu0 %v3448_v41  ;;  %1766 = vmatpush1.bf16.msra.mxu1 %v3451_v42  ;;  %v3549_v41 = vld [vmem:[#allocation5 + $0x524] ss:$16 sps:$4 sm:$0xff]   ;;  %v3552_v42 = vld [vmem:[#allocation5 + $0x52c] ss:$16 sps:$4 sm:$0xff]  }
  0xd6   :  { %1595 = vmatprep.subr.bf16.mxu0 %v3456_v43  ;;  %1767 = vmatprep.subr.bf16.mxu1 %v3459_v44  ;;  %v3547_v43 = vld [vmem:[#allocation5 + $0x520] ss:$16 sps:$4 sm:$0xff]   ;;  %v3550_v44 = vld [vmem:[#allocation5 + $0x528] ss:$16 sps:$4 sm:$0xff]  }
  0xd9   :  { %1596 = vmatpush1.bf16.msra.mxu0 %v3454_v45  ;;  %1768 = vmatpush1.bf16.msra.mxu1 %v3457_v46  ;;  %v3555_v45 = vld [vmem:[#allocation5 + $0x544] ss:$16 sps:$4 sm:$0xff]   ;;  %v3558_v46 = vld [vmem:[#allocation5 + $0x54c] ss:$16 sps:$4 sm:$0xff]  }
  0xda   :  { %1597 = vmatprep.subr.bf16.mxu0 %v3462_v47  ;;  %1769 = vmatprep.subr.bf16.mxu1 %v3465_v48  ;;  %v3553_v47 = vld [vmem:[#allocation5 + $0x540] ss:$16 sps:$4 sm:$0xff]   ;;  %v3556_v48 = vld [vmem:[#allocation5 + $0x548] ss:$16 sps:$4 sm:$0xff]  }
  0xdd   :  { %1598 = vmatpush1.bf16.msra.mxu0 %v3460_v49  ;;  %1770 = vmatpush1.bf16.msra.mxu1 %v3463_v50  ;;  %v3561_v49 = vld [vmem:[#allocation5 + $0x564] ss:$16 sps:$4 sm:$0xff]   ;;  %v3564_v50 = vld [vmem:[#allocation5 + $0x56c] ss:$16 sps:$4 sm:$0xff]  }
  0xde   :  { %1599 = vmatprep.subr.bf16.mxu0 %v3468_v51  ;;  %1771 = vmatprep.subr.bf16.mxu1 %v3471_v52  ;;  %v3559_v51 = vld [vmem:[#allocation5 + $0x560] ss:$16 sps:$4 sm:$0xff]   ;;  %v3562_v52 = vld [vmem:[#allocation5 + $0x568] ss:$16 sps:$4 sm:$0xff]  }
  0xe1   :  { %1600 = vmatpush1.bf16.msra.mxu0 %v3466_v53  ;;  %1772 = vmatpush1.bf16.msra.mxu1 %v3469_v54  ;;  %v3567_v53 = vld [vmem:[#allocation5 + $0x584] ss:$16 sps:$4 sm:$0xff]   ;;  %v3570_v54 = vld [vmem:[#allocation5 + $0x58c] ss:$16 sps:$4 sm:$0xff]  }
  0xe2   :  { %1601 = vmatprep.subr.bf16.mxu0 %v3474_v55  ;;  %1773 = vmatprep.subr.bf16.mxu1 %v3477_v56  ;;  %v3565_v55 = vld [vmem:[#allocation5 + $0x580] ss:$16 sps:$4 sm:$0xff]   ;;  %v3568_v56 = vld [vmem:[#allocation5 + $0x588] ss:$16 sps:$4 sm:$0xff]  }
  0xe5   :  { %1602 = vmatpush1.bf16.msra.mxu0 %v3472_v57  ;;  %1774 = vmatpush1.bf16.msra.mxu1 %v3475_v58  ;;  %v3573_v57 = vld [vmem:[#allocation5 + $0x5a4] ss:$16 sps:$4 sm:$0xff]   ;;  %v3576_v58 = vld [vmem:[#allocation5 + $0x5ac] ss:$16 sps:$4 sm:$0xff]  }
  0xe6   :  { %1603 = vmatprep.subr.bf16.mxu0 %v3480_v59  ;;  %1775 = vmatprep.subr.bf16.mxu1 %v3483_v60  ;;  %v3571_v59 = vld [vmem:[#allocation5 + $0x5a0] ss:$16 sps:$4 sm:$0xff]   ;;  %v3574_v60 = vld [vmem:[#allocation5 + $0x5a8] ss:$16 sps:$4 sm:$0xff]  }
  0xe9   :  { %1604 = vmatpush1.bf16.msra.mxu0 %v3478_v61  ;;  %1776 = vmatpush1.bf16.msra.mxu1 %v3481_v62  ;;  %v3579_v61 = vld [vmem:[#allocation5 + $0x5c4] ss:$16 sps:$4 sm:$0xff]   ;;  %v3582_v62 = vld [vmem:[#allocation5 + $0x5cc] ss:$16 sps:$4 sm:$0xff]  }
  0xea   :  { %1605 = vmatprep.subr.bf16.mxu0 %v3486_v63  ;;  %1777 = vmatprep.subr.bf16.mxu1 %v3489_v0  ;;  %v3577_v63 = vld [vmem:[#allocation5 + $0x5c0] ss:$16 sps:$4 sm:$0xff]   ;;  %v3580_v0 = vld [vmem:[#allocation5 + $0x5c8] ss:$16 sps:$4 sm:$0xff]  }
  0xed   :  { %1606 = vmatpush1.bf16.msra.mxu0 %v3484_v1  ;;  %1778 = vmatpush1.bf16.msra.mxu1 %v3487_v2  ;;  %v3585_v1 = vld [vmem:[#allocation5 + $0x5e4] ss:$16 sps:$4 sm:$0xff]   ;;  %v3588_v2 = vld [vmem:[#allocation5 + $0x5ec] ss:$16 sps:$4 sm:$0xff]  }
  0xee   :  { %1618 = vmatprep.subr.bf16.mxu0 %v3495_v3  ;;  %1790 = vmatprep.subr.bf16.mxu1 %v3498_v4  ;;  %v3583_v3 = vld [vmem:[#allocation5 + $0x5e0] ss:$16 sps:$4 sm:$0xff]   ;;  %v3586_v4 = vld [vmem:[#allocation5 + $0x5e8] ss:$16 sps:$4 sm:$0xff]  }
  0xf0   :  { %1608 = vmatmul.mubr.bf16.vlgmr.msra.gmra.mrb[0].mxu0 %v3490_v5  ;;  %1780 = vmatmul.mubr.bf16.vlgmr.msra.gmra.mrb[0].mxu1 %v3490_v5  ;;  %v3594_v5 = vld [vmem:[#allocation5 + $0x604] ss:$16 sps:$4 sm:$0xff]  }
  0xf1   :  { %1619 = vmatpush1.bf16.msra.mxu0 %v3493_v6  ;;  %1791 = vmatpush1.bf16.msra.mxu1 %v3496_v7  ;;  %v3597_v6 = vld [vmem:[#allocation5 + $0x60c] ss:$16 sps:$4 sm:$0xff]   ;;  %v3589_v7 = vld [vmem:[#allocation2 + $0x10] ss:$28 sps:$4 sm:$0xff]  }
  0xf2   :  { %1620 = vmatprep.subr.bf16.mxu0 %v3501_v8  ;;  %1792 = vmatprep.subr.bf16.mxu1 %v3504_v9  ;;  %v3592_v8 = vld [vmem:[#allocation5 + $0x600] ss:$16 sps:$4 sm:$0xff]   ;;  %v3595_v9 = vld [vmem:[#allocation5 + $0x608] ss:$16 sps:$4 sm:$0xff]  }
  0xf3   :  { %1650 = vmatprep.mubr.bf16.mxu0 %v3591_v12  ;;  %1822 = vmatprep.mubr.bf16.mxu1 %v3591_v12  ;;  %v3598_v12 = vld [vmem:[#allocation5 + $0x620] ss:$16 sps:$4 sm:$0xff]  }
  0xf5   :  { %1621 = vmatpush1.bf16.msra.mxu0 %v3499_v10  ;;  %1793 = vmatpush1.bf16.msra.mxu1 %v3502_v11  ;;  %v3600_v10 = vld [vmem:[#allocation5 + $0x624] ss:$16 sps:$4 sm:$0xff]   ;;  %v3603_v11 = vld [vmem:[#allocation5 + $0x62c] ss:$16 sps:$4 sm:$0xff]  }
  0xf6   :  { %1622 = vmatprep.subr.bf16.mxu0 %v3507_v13  ;;  %1794 = vmatprep.subr.bf16.mxu1 %v3510_v14  ;;  %v3601_v13 = vld [vmem:[#allocation5 + $0x628] ss:$16 sps:$4 sm:$0xff]   ;;  %v3606_v14 = vld [vmem:[#allocation5 + $0x644] ss:$16 sps:$4 sm:$0xff]  }
  0xf9   :  { %1623 = vmatpush1.bf16.msra.mxu0 %v3505_v15  ;;  %1795 = vmatpush1.bf16.msra.mxu1 %v3508_v16  ;;  %v3609_v15 = vld [vmem:[#allocation5 + $0x64c] ss:$16 sps:$4 sm:$0xff]   ;;  %v3604_v16 = vld [vmem:[#allocation5 + $0x640] ss:$16 sps:$4 sm:$0xff]  }
  0xfa   :  { %1624 = vmatprep.subr.bf16.mxu0 %v3513_v17  ;;  %1796 = vmatprep.subr.bf16.mxu1 %v3516_v18  ;;  %v3607_v17 = vld [vmem:[#allocation5 + $0x648] ss:$16 sps:$4 sm:$0xff]   ;;  %v3955_v18 = vmov 0  }
  0xfd   :  { %1625 = vmatpush1.bf16.msra.mxu0 %v3511_v19  ;;  %1797 = vmatpush1.bf16.msra.mxu1 %v3514_v20  ;;  %v3612_v19 = vld [vmem:[#allocation5 + $0x664] ss:$16 sps:$4 sm:$0xff]   ;;  %v3615_v20 = vld [vmem:[#allocation5 + $0x66c] ss:$16 sps:$4 sm:$0xff]  }
  0xfe   :  { %1626 = vmatprep.subr.bf16.mxu0 %v3519_v21  ;;  %1798 = vmatprep.subr.bf16.mxu1 %v3522_v22  ;;  %v3610_v21 = vld [vmem:[#allocation5 + $0x660] ss:$16 sps:$4 sm:$0xff]   ;;  %v3613_v22 = vld [vmem:[#allocation5 + $0x668] ss:$16 sps:$4 sm:$0xff]  }
 0x101   :  { %1627 = vmatpush1.bf16.msra.mxu0 %v3517_v23  ;;  %1799 = vmatpush1.bf16.msra.mxu1 %v3520_v24  ;;  %v3618_v23 = vld [vmem:[#allocation5 + $0x684] ss:$16 sps:$4 sm:$0xff]   ;;  %v3621_v24 = vld [vmem:[#allocation5 + $0x68c] ss:$16 sps:$4 sm:$0xff]  }
 0x102   :  { %1628 = vmatprep.subr.bf16.mxu0 %v3525_v25  ;;  %1800 = vmatprep.subr.bf16.mxu1 %v3528_v26  ;;  %v3616_v25 = vld [vmem:[#allocation5 + $0x680] ss:$16 sps:$4 sm:$0xff]   ;;  %v3619_v26 = vld [vmem:[#allocation5 + $0x688] ss:$16 sps:$4 sm:$0xff]  }
 0x105   :  { %1629 = vmatpush1.bf16.msra.mxu0 %v3523_v27  ;;  %1801 = vmatpush1.bf16.msra.mxu1 %v3526_v28  ;;  %v3624_v27 = vld [vmem:[#allocation5 + $0x6a4] ss:$16 sps:$4 sm:$0xff]   ;;  %v3627_v28 = vld [vmem:[#allocation5 + $0x6ac] ss:$16 sps:$4 sm:$0xff]  }
 0x106   :  { %1630 = vmatprep.subr.bf16.mxu0 %v3531_v29  ;;  %1802 = vmatprep.subr.bf16.mxu1 %v3534_v30  ;;  %v3622_v29 = vld [vmem:[#allocation5 + $0x6a0] ss:$16 sps:$4 sm:$0xff]   ;;  %v3625_v30 = vld [vmem:[#allocation5 + $0x6a8] ss:$16 sps:$4 sm:$0xff]  }
 0x109   :  { %1631 = vmatpush1.bf16.msra.mxu0 %v3529_v31  ;;  %1803 = vmatpush1.bf16.msra.mxu1 %v3532_v32  ;;  %v3630_v31 = vld [vmem:[#allocation5 + $0x6c4] ss:$16 sps:$4 sm:$0xff]   ;;  %v3633_v32 = vld [vmem:[#allocation5 + $0x6cc] ss:$16 sps:$4 sm:$0xff]  }
 0x10a   :  { %1632 = vmatprep.subr.bf16.mxu0 %v3537_v33  ;;  %1804 = vmatprep.subr.bf16.mxu1 %v3540_v34  ;;  %v3628_v33 = vld [vmem:[#allocation5 + $0x6c0] ss:$16 sps:$4 sm:$0xff]   ;;  %v3631_v34 = vld [vmem:[#allocation5 + $0x6c8] ss:$16 sps:$4 sm:$0xff]  }
 0x10d   :  { %1633 = vmatpush1.bf16.msra.mxu0 %v3535_v35  ;;  %1805 = vmatpush1.bf16.msra.mxu1 %v3538_v36  ;;  %v3636_v35 = vld [vmem:[#allocation5 + $0x6e4] ss:$16 sps:$4 sm:$0xff]   ;;  %v3639_v36 = vld [vmem:[#allocation5 + $0x6ec] ss:$16 sps:$4 sm:$0xff]  }
 0x10e   :  { %1634 = vmatprep.subr.bf16.mxu0 %v3543_v37  ;;  %1806 = vmatprep.subr.bf16.mxu1 %v3546_v38  ;;  %v3634_v37 = vld [vmem:[#allocation5 + $0x6e0] ss:$16 sps:$4 sm:$0xff]   ;;  %v3637_v38 = vld [vmem:[#allocation5 + $0x6e8] ss:$16 sps:$4 sm:$0xff]  }
 0x111   :  { %1635 = vmatpush1.bf16.msra.mxu0 %v3541_v39  ;;  %1807 = vmatpush1.bf16.msra.mxu1 %v3544_v40  ;;  %v3643_v39 = vld [vmem:[#allocation7 + $0x4] ss:$8 sps:$4 sm:$0xff]   ;;  %v3640_v40 = vld [vmem:[#allocation2 + $0x18] ss:$28 sps:$4 sm:$0xff]  }
 0x112   :  { %1636 = vmatprep.subr.bf16.mxu0 %v3549_v41  ;;  %1808 = vmatprep.subr.bf16.mxu1 %v3552_v42  ;;  %v3641_v41 = vld [vmem:[#allocation7] ss:$8 sps:$4 sm:$0xff]   ;;  %v3646_v42 = vld [vmem:[#allocation7 + $0x14] ss:$8 sps:$4 sm:$0xff]  }
 0x115   :  { %1637 = vmatpush1.bf16.msra.mxu0 %v3547_v43  ;;  %1809 = vmatpush1.bf16.msra.mxu1 %v3550_v44  ;;  %v3644_v43 = vld [vmem:[#allocation7 + $0x10] ss:$8 sps:$4 sm:$0xff]   ;;  %v3649_v44 = vld [vmem:[#allocation7 + $0x24] ss:$8 sps:$4 sm:$0xff]  }
 0x116   :  { %1638 = vmatprep.subr.bf16.mxu0 %v3555_v45  ;;  %1810 = vmatprep.subr.bf16.mxu1 %v3558_v46  ;;  %v3647_v45 = vld [vmem:[#allocation7 + $0x20] ss:$8 sps:$4 sm:$0xff]   ;;  %v3652_v46 = vld [vmem:[#allocation7 + $0x34] ss:$8 sps:$4 sm:$0xff]  }
 0x119   :  { %1639 = vmatpush1.bf16.msra.mxu0 %v3553_v47  ;;  %1811 = vmatpush1.bf16.msra.mxu1 %v3556_v48  ;;  %v3650_v47 = vld [vmem:[#allocation7 + $0x30] ss:$8 sps:$4 sm:$0xff]   ;;  %v3655_v48 = vld [vmem:[#allocation7 + $0x44] ss:$8 sps:$4 sm:$0xff]  }
 0x11a   :  { %1640 = vmatprep.subr.bf16.mxu0 %v3561_v49  ;;  %1812 = vmatprep.subr.bf16.mxu1 %v3564_v50  ;;  %v3653_v49 = vld [vmem:[#allocation7 + $0x40] ss:$8 sps:$4 sm:$0xff]   ;;  %v3658_v50 = vld [vmem:[#allocation7 + $0x54] ss:$8 sps:$4 sm:$0xff]  }
 0x11d   :  { %1641 = vmatpush1.bf16.msra.mxu0 %v3559_v51  ;;  %1813 = vmatpush1.bf16.msra.mxu1 %v3562_v52  ;;  %v3656_v51 = vld [vmem:[#allocation7 + $0x50] ss:$8 sps:$4 sm:$0xff]   ;;  %v3661_v52 = vld [vmem:[#allocation7 + $0x64] ss:$8 sps:$4 sm:$0xff]  }
 0x11e   :  { %1642 = vmatprep.subr.bf16.mxu0 %v3567_v53  ;;  %1814 = vmatprep.subr.bf16.mxu1 %v3570_v54  ;;  %v3659_v53 = vld [vmem:[#allocation7 + $0x60] ss:$8 sps:$4 sm:$0xff]   ;;  %v3664_v54 = vld [vmem:[#allocation7 + $0x74] ss:$8 sps:$4 sm:$0xff]  }
 0x121   :  { %1643 = vmatpush1.bf16.msra.mxu0 %v3565_v55  ;;  %1815 = vmatpush1.bf16.msra.mxu1 %v3568_v56  ;;  %v3662_v55 = vld [vmem:[#allocation7 + $0x70] ss:$8 sps:$4 sm:$0xff]   ;;  %v3667_v56 = vld [vmem:[#allocation7 + $0x84] ss:$8 sps:$4 sm:$0xff]  }
 0x122   :  { %1644 = vmatprep.subr.bf16.mxu0 %v3573_v57  ;;  %1816 = vmatprep.subr.bf16.mxu1 %v3576_v58  ;;  %v3665_v57 = vld [vmem:[#allocation7 + $0x80] ss:$8 sps:$4 sm:$0xff]   ;;  %v3670_v58 = vld [vmem:[#allocation7 + $0x94] ss:$8 sps:$4 sm:$0xff]  }
 0x125   :  { %1645 = vmatpush1.bf16.msra.mxu0 %v3571_v59  ;;  %1817 = vmatpush1.bf16.msra.mxu1 %v3574_v60  ;;  %v3668_v59 = vld [vmem:[#allocation7 + $0x90] ss:$8 sps:$4 sm:$0xff]   ;;  %v3673_v60 = vld [vmem:[#allocation7 + $0xa4] ss:$8 sps:$4 sm:$0xff]  }
 0x126   :  { %1646 = vmatprep.subr.bf16.mxu0 %v3579_v61  ;;  %1818 = vmatprep.subr.bf16.mxu1 %v3582_v62  ;;  %v3671_v61 = vld [vmem:[#allocation7 + $0xa0] ss:$8 sps:$4 sm:$0xff]   ;;  %v3676_v62 = vld [vmem:[#allocation7 + $0xb4] ss:$8 sps:$4 sm:$0xff]  }
 0x129   :  { %1647 = vmatpush1.bf16.msra.mxu0 %v3577_v63  ;;  %1819 = vmatpush1.bf16.msra.mxu1 %v3580_v0  ;;  %v3674_v63 = vld [vmem:[#allocation7 + $0xb0] ss:$8 sps:$4 sm:$0xff]   ;;  %v3679_v0 = vld [vmem:[#allocation7 + $0xc4] ss:$8 sps:$4 sm:$0xff]  }
 0x12a   :  { %1648 = vmatprep.subr.bf16.mxu0 %v3585_v1  ;;  %1820 = vmatprep.subr.bf16.mxu1 %v3588_v2  ;;  %v3677_v1 = vld [vmem:[#allocation7 + $0xc0] ss:$8 sps:$4 sm:$0xff]   ;;  %v3682_v2 = vld [vmem:[#allocation7 + $0xd4] ss:$8 sps:$4 sm:$0xff]  }
 0x12d   :  { %1649 = vmatpush1.bf16.msra.mxu0 %v3583_v3  ;;  %1821 = vmatpush1.bf16.msra.mxu1 %v3586_v4  ;;  %v3680_v3 = vld [vmem:[#allocation7 + $0xd0] ss:$8 sps:$4 sm:$0xff]   ;;  %v3685_v4 = vld [vmem:[#allocation7 + $0xe4] ss:$8 sps:$4 sm:$0xff]  }
 0x12e   :  { %1661 = vmatprep.subr.bf16.mxu0 %v3594_v5  ;;  %1833 = vmatprep.subr.bf16.mxu1 %v3597_v6  ;;  %v3683_v5 = vld [vmem:[#allocation7 + $0xe0] ss:$8 sps:$4 sm:$0xff]   ;;  %v3688_v6 = vld [vmem:[#allocation7 + $0xf4] ss:$8 sps:$4 sm:$0xff]  }
 0x130   :  { %1651 = vmatmul.mubr.bf16.vlgmr.msra.gmra.mrb[0].mxu0 %v3589_v7  ;;  %1823 = vmatmul.mubr.bf16.vlgmr.msra.gmra.mrb[0].mxu1 %v3589_v7  ;;  %v3686_v7 = vld [vmem:[#allocation7 + $0xf0] ss:$8 sps:$4 sm:$0xff]  }
 0x131   :  { %1662 = vmatpush1.bf16.msra.mxu0 %v3592_v8  ;;  %1834 = vmatpush1.bf16.msra.mxu1 %v3595_v9  ;;  %v3691_v8 = vld [vmem:[#allocation7 + $0x104] ss:$8 sps:$4 sm:$0xff]  }
 0x132   :  { %1663 = vmatprep.subr.bf16.mxu0 %v3600_v10  ;;  %1835 = vmatprep.subr.bf16.mxu1 %v3603_v11  ;;  %v3737_v9 = vld [vmem:[#allocation8 + $0x40] sm:$0xff]   ;;  %v3739_v11 = vld [vmem:[#allocation8 + $0x48] sm:$0xff]  }
 0x133   :  { %1693 = vmatprep.mubr.bf16.mxu0 %v3955_v18  ;;  %1865 = vmatprep.mubr.bf16.mxu1 %v3955_v18  ;;  %v3738_v10 = vld [vmem:[#allocation8] sm:$0xff]  }
 0x134   :  { %v3746_v18 = vld [vmem:[#allocation8 + $0x20] sm:$0xff]  }
 0x135   :  { %1664 = vmatpush1.bf16.msra.mxu0 %v3598_v12  ;;  %1836 = vmatpush1.bf16.msra.mxu1 %v3601_v13  ;;  %v3740_v12 = vld [vmem:[#allocation8 + $0x8] sm:$0xff]   ;;  %v3741_v13 = vld [vmem:[#allocation8 + $0x50] sm:$0xff]  }
 0x136   :  { %1665 = vmatprep.subr.bf16.mxu0 %v3606_v14  ;;  %1837 = vmatprep.subr.bf16.mxu1 %v3609_v15  ;;  %v3742_v14 = vld [vmem:[#allocation8 + $0x10] sm:$0xff]   ;;  %v3743_v15 = vld [vmem:[#allocation8 + $0x58] sm:$0xff]  }
 0x139   :  { %1666 = vmatpush1.bf16.msra.mxu0 %v3604_v16  ;;  %1838 = vmatpush1.bf16.msra.mxu1 %v3607_v17  ;;  %v3744_v16 = vld [vmem:[#allocation8 + $0x18] sm:$0xff]   ;;  %v3745_v17 = vld [vmem:[#allocation8 + $0x60] sm:$0xff]  }
 0x13a   :  { %1667 = vmatprep.subr.bf16.mxu0 %v3612_v19  ;;  %1839 = vmatprep.subr.bf16.mxu1 %v3615_v20  ;;  %v3747_v19 = vld [vmem:[#allocation8 + $0x68] sm:$0xff]   ;;  %v356_v20 = vlaneseq }
 0x13d   :  { %1668 = vmatpush1.bf16.msra.mxu0 %v3610_v21  ;;  %1840 = vmatpush1.bf16.msra.mxu1 %v3613_v22  ;;  %v4111_v21 = vshrl.u32 %v356_v20, 7 }
 0x13e   :  { %1669 = vmatprep.subr.bf16.mxu0 %v3618_v23  ;;  %1841 = vmatprep.subr.bf16.mxu1 %v3621_v24  ;;  %v354_v24 = vld [vmem:[%s4181_s2] sm:$0xf] }
 0x13f   :  { %v358_v22 = vsub.s32 0, %v4111_v21  ;;  %v366_v23 = vsub.s32 2, %v4111_v21 }
 0x141   :  { %1670 = vmatpush1.bf16.msra.mxu0 %v3616_v25  ;;  %1842 = vmatpush1.bf16.msra.mxu1 %v3619_v26  ;;  %v362_v25 = vsub.s32 1, %v4111_v21  ;;  %v370_v26 = vsub.s32 3, %v4111_v21  ;;  %v3754_v21 = vld [vmem:[#allocation10 + $0x8] sm:$0xff]  }
 0x142   :  { %1671 = vmatprep.subr.bf16.mxu0 %v3624_v27  ;;  %1843 = vmatprep.subr.bf16.mxu1 %v3627_v28  ;;  %v359_v27 = vrot.slane %v354_v24, %v358_v22  ;;  %v367_v28 = vrot.slane %v354_v24, %v366_v23  ;;  %v3730_v23 = vld [vmem:[#allocation7 + $0x1d4] ss:$8 sps:$4 sm:$0xff]  }
 0x145   :  { %1672 = vmatpush1.bf16.msra.mxu0 %v3622_v29  ;;  %1844 = vmatpush1.bf16.msra.mxu1 %v3625_v30  ;;  %v363_v29 = vrot.slane %v354_v24, %v362_v25  ;;  %v371_v30 = vrot.slane %v354_v24, %v370_v26  ;;  %v3728_v24 = vld [vmem:[#allocation7 + $0x1d0] ss:$8 sps:$4 sm:$0xff]   ;;  %v3733_v26 = vld [vmem:[#allocation7 + $0x1e4] ss:$8 sps:$4 sm:$0xff]  }
 0x146   :  { %1673 = vmatprep.subr.bf16.mxu0 %v3630_v31  ;;  %1845 = vmatprep.subr.bf16.mxu1 %v3633_v32 }
 0x149   :  { %1674 = vmatpush1.bf16.msra.mxu0 %v3628_v33  ;;  %1846 = vmatpush1.bf16.msra.mxu1 %v3631_v34 }
 0x14a   :  { %1675 = vmatprep.subr.bf16.mxu0 %v3636_v35  ;;  %1847 = vmatprep.subr.bf16.mxu1 %v3639_v36 }
 0x14d   :  { %1676 = vmatpush1.bf16.msra.mxu0 %v3634_v37  ;;  %1848 = vmatpush1.bf16.msra.mxu1 %v3637_v38 }
 0x14e   :  { %2284 = vmatprep.subr.bf16.mxu0 %v3643_v39  ;;  %3157 = vmatprep.subr.bf16.mxu1 %v3737_v9  ;;  %v3710_v9 = vld [vmem:[#allocation7 + $0x170] ss:$8 sps:$4 sm:$0xff]  }
 0x150   :  { %1694 = vmatmul.mubr.bf16.vlgmr.msra.gmra.mrb[0].mxu0 %v3640_v40  ;;  %1866 = vmatmul.mubr.bf16.vlgmr.msra.gmra.mrb[0].mxu1 %v3640_v40 }
 0x151   :  { %2285 = vmatpush1.bf16.msra.mxu0 %v3641_v41  ;;  %3158 = vmatpush3.bf16.msra.mxu1 %v3738_v10  ;;  %v3715_v10 = vld [vmem:[#allocation7 + $0x184] ss:$8 sps:$4 sm:$0xff]  }
 0x152   :  { %2286 = vmatprep.subr.bf16.mxu0 %v3646_v42  ;;  %3159 = vmatprep.subr.bf16.mxu1 %v3739_v11  ;;  %v3713_v11 = vld [vmem:[#allocation7 + $0x180] ss:$8 sps:$4 sm:$0xff]  }
 0x155   :  { %2287 = vmatpush1.bf16.msra.mxu0 %v3644_v43  ;;  %3160 = vmatpush3.bf16.msra.mxu1 %v3740_v12  ;;  %v3718_v12 = vld [vmem:[#allocation7 + $0x194] ss:$8 sps:$4 sm:$0xff]  }
 0x156   :  { %2288 = vmatprep.subr.bf16.mxu0 %v3649_v44  ;;  %3161 = vmatprep.subr.bf16.mxu1 %v3741_v13  ;;  %v3716_v13 = vld [vmem:[#allocation7 + $0x190] ss:$8 sps:$4 sm:$0xff]  }
 0x159   :  { %2289 = vmatpush1.bf16.msra.mxu0 %v3647_v45  ;;  %3162 = vmatpush3.bf16.msra.mxu1 %v3742_v14  ;;  %v3721_v14 = vld [vmem:[#allocation7 + $0x1a4] ss:$8 sps:$4 sm:$0xff]  }
 0x15a   :  { %2290 = vmatprep.subr.bf16.mxu0 %v3652_v46  ;;  %3163 = vmatprep.subr.bf16.mxu1 %v3743_v15  ;;  %v3719_v15 = vld [vmem:[#allocation7 + $0x1a0] ss:$8 sps:$4 sm:$0xff]  }
 0x15d   :  { %2291 = vmatpush1.bf16.msra.mxu0 %v3650_v47  ;;  %3164 = vmatpush3.bf16.msra.mxu1 %v3744_v16  ;;  %v3724_v16 = vld [vmem:[#allocation7 + $0x1b4] ss:$8 sps:$4 sm:$0xff]  }
 0x15e   :  { %2292 = vmatprep.subr.bf16.mxu0 %v3655_v48  ;;  %3165 = vmatprep.subr.bf16.mxu1 %v3745_v17  ;;  %v3722_v17 = vld [vmem:[#allocation7 + $0x1b0] ss:$8 sps:$4 sm:$0xff]  }
 0x161   :  { %2293 = vmatpush1.bf16.msra.mxu0 %v3653_v49  ;;  %3166 = vmatpush3.bf16.msra.mxu1 %v3746_v18  ;;  %v3727_v18 = vld [vmem:[#allocation7 + $0x1c4] ss:$8 sps:$4 sm:$0xff]  }
 0x162   :  { %2294 = vmatprep.subr.bf16.mxu0 %v3658_v50  ;;  %3167 = vmatprep.subr.bf16.mxu1 %v3747_v19  ;;  %v3725_v19 = vld [vmem:[#allocation7 + $0x1c0] ss:$8 sps:$4 sm:$0xff]  }
 0x165   :  { %2295 = vmatpush1.bf16.msra.mxu0 %v3656_v51 }
 0x166   :  { %2296 = vmatprep.subr.bf16.mxu0 %v3661_v52 }
 0x169   :  { %2297 = vmatpush1.bf16.msra.mxu0 %v3659_v53 }
 0x16a   :  { %2298 = vmatprep.subr.bf16.mxu0 %v3664_v54 }
 0x16d   :  { %2299 = vmatpush1.bf16.msra.mxu0 %v3662_v55 }
 0x16e   :  { %2300 = vmatprep.subr.bf16.mxu0 %v3667_v56 }
 0x171   :  { %2301 = vmatpush1.bf16.msra.mxu0 %v3665_v57 }
 0x172   :  { %2302 = vmatprep.subr.bf16.mxu0 %v3670_v58 }
 0x175   :  { %2303 = vmatpush1.bf16.msra.mxu0 %v3668_v59  ;;  %v3689_v59 = vld [vmem:[#allocation7 + $0x100] ss:$8 sps:$4 sm:$0xff]  }
 0x176   :  { %2304 = vmatprep.subr.bf16.mxu0 %v3673_v60  ;;  %v3694_v60 = vld [vmem:[#allocation7 + $0x114] ss:$8 sps:$4 sm:$0xff]  }
 0x179   :  { %2305 = vmatpush1.bf16.msra.mxu0 %v3671_v61  ;;  %v3692_v61 = vld [vmem:[#allocation7 + $0x110] ss:$8 sps:$4 sm:$0xff]  }
 0x17a   :  { %2306 = vmatprep.subr.bf16.mxu0 %v3676_v62  ;;  %v3697_v62 = vld [vmem:[#allocation7 + $0x124] ss:$8 sps:$4 sm:$0xff]  }
 0x17d   :  { %2307 = vmatpush1.bf16.msra.mxu0 %v3674_v63  ;;  %v3695_v63 = vld [vmem:[#allocation7 + $0x120] ss:$8 sps:$4 sm:$0xff]  }
 0x17e   :  { %2308 = vmatprep.subr.bf16.mxu0 %v3679_v0  ;;  %v3700_v0 = vld [vmem:[#allocation7 + $0x134] ss:$8 sps:$4 sm:$0xff]  }
 0x181   :  { %2309 = vmatpush1.bf16.msra.mxu0 %v3677_v1  ;;  %v3698_v1 = vld [vmem:[#allocation7 + $0x130] ss:$8 sps:$4 sm:$0xff]  }
 0x182   :  { %2310 = vmatprep.subr.bf16.mxu0 %v3682_v2  ;;  %v3703_v2 = vld [vmem:[#allocation7 + $0x144] ss:$8 sps:$4 sm:$0xff]  }
 0x185   :  { %2311 = vmatpush1.bf16.msra.mxu0 %v3680_v3  ;;  %v3701_v3 = vld [vmem:[#allocation7 + $0x140] ss:$8 sps:$4 sm:$0xff]  }
 0x186   :  { %2312 = vmatprep.subr.bf16.mxu0 %v3685_v4  ;;  %v3706_v4 = vld [vmem:[#allocation7 + $0x154] ss:$8 sps:$4 sm:$0xff]  }
 0x189   :  { %2313 = vmatpush1.bf16.msra.mxu0 %v3683_v5  ;;  %v3704_v5 = vld [vmem:[#allocation7 + $0x150] ss:$8 sps:$4 sm:$0xff]  }
 0x18a   :  { %2314 = vmatprep.subr.bf16.mxu0 %v3688_v6  ;;  %v3709_v6 = vld [vmem:[#allocation7 + $0x164] ss:$8 sps:$4 sm:$0xff]  }
 0x18d   :  { %2315 = vmatpush1.bf16.msra.mxu0 %v3686_v7  ;;  %v3707_v7 = vld [vmem:[#allocation7 + $0x160] ss:$8 sps:$4 sm:$0xff]  }
 0x18e   :  { %2327 = vmatprep.subr.bf16.mxu0 %v3691_v8  ;;  %v3712_v8 = vld [vmem:[#allocation7 + $0x174] ss:$8 sps:$4 sm:$0xff]  }
 0x223   :  { %v1695_v31 = vpop.f32.mrb[0].mxu0  ;;  %v1867_v32 = vpop.f32.mrb[0].mxu1 }
 0x224   :  { %v3237_v33 = vadd.f32 %v1695_v31, %v359_v27  ;;  %v3241_v34 = vadd.f32 %v1867_v32, %v367_v28  ;;  %v1697_v35 = vpop.f32.mrb[1].mxu0  ;;  %v1869_v36 = vpop.f32.mrb[1].mxu1  ;;  %v3749_v31 = vld [vmem:[#allocation8 + $0x70] sm:$0xff]  }
 0x225   :  { %v3238_v37 = vadd.f32 %v1697_v35, %v363_v29  ;;  %v3242_v38 = vadd.f32 %v1869_v36, %v371_v30  ;;  %v1699_v39 = vpop.f32.mrb[2].mxu0  ;;  %v1871_v40 = vpop.f32.mrb[2].mxu1  ;;  %v3750_v32 = vld [vmem:[#allocation8 + $0x30] sm:$0xff]   ;;  %v3956_v35 = vmov 0.0   ;;  %v1952_v36 = vld [vmem:[%s4183_s4] sm:$0x3] }
 0x226   :  { %v3239_v41 = vadd.f32 %v1699_v39, %v359_v27  ;;  %v3243_v42 = vadd.f32 %v1871_v40, %v367_v28  ;;  %v1701_v43 = vpop.f32.mrb[3].mxu0  ;;  %v1873_v44 = vpop.f32.mrb[3].mxu1  ;;  %v1876_v47 = vmax.f32 %v3237_v33, 0.0  ;;  %v1878_v48 = vmax.f32 %v3241_v34, 0.0  ;;  %v3731_v27 = vld [vmem:[#allocation7 + $0x1e0] ss:$8 sps:$4 sm:$0xff]  }
 0x227   :  { %v3240_v45 = vadd.f32 %v1701_v43, %v363_v29  ;;  %v3244_v46 = vadd.f32 %v1873_v44, %v371_v30  ;;  %v1877_v51 = vmax.f32 %v3238_v37, 0.0  ;;  %v1879_v52 = vmax.f32 %v3242_v38, 0.0  ;;  %v3736_v28 = vld [vmem:[#allocation7 + $0x1f4] ss:$8 sps:$4 sm:$0xff]   ;;  %v3734_v29 = vld [vmem:[#allocation7 + $0x1f0] ss:$8 sps:$4 sm:$0xff]  }
 0x228   :  { %v1880_v49 = vmax.f32 %v3239_v41, 0.0  ;;  %v1882_v50 = vmax.f32 %v3243_v42, 0.0  ;;  %v3748_v30 = vld [vmem:[#allocation8 + $0x28] sm:$0xff]   ;;  %v3751_v33 = vld [vmem:[#allocation8 + $0x78] sm:$0xff]   ;;  %v1957_v37 = vrot.slane %v1952_v36, %v358_v22  ;;  %v1961_v38 = vrot.slane %v1952_v36, %v362_v25  ;;  %v3755_v22 = vld [vmem:[#allocation10 + $0x10] sm:$0xff]  }
 0x229   :  { %v1881_v53 = vmax.f32 %v3240_v45, 0.0  ;;  %v1883_v54 = vmax.f32 %v3244_v46, 0.0  ;;  %3168 = vmatpush3.bf16.msra.mxu1 %v3748_v30  ;;  %v3752_v34 = vld [vmem:[#allocation8 + $0x38] sm:$0xff]  }
 0x22a   :  { %v1884_v55 = vpack.c.bf16 %v1880_v49, %v1876_v47  ;;  %v4124_v56 = vpack.c.bf16 %v1882_v50, %v1878_v48  ;;  %3169 = vmatprep.subr.bf16.mxu1 %v3749_v31  ;;  %v3756_v25 = vld [vmem:[#allocation10 + $0x18] sm:$0xff]  }
 0x22b   :  { %v1885_v57 = vpack.c.bf16 %v1881_v53, %v1877_v51  ;;  %v1887_v58 = vpack.c.bf16 %v1883_v54, %v1879_v52  ;;  %v3753_v53 = vld [vmem:[#allocation10] sm:$0xff]  }
 0x22c   :  { %v3757_v54 = vld [vmem:[#allocation10 + $0x20] sm:$0xff]  }
 0x22d   :  { %2316 = vmatprep.mubr.bf16.mxu0 %v1885_v57  ;;  %3170 = vmatpush3.bf16.msra.mxu1 %v3750_v32  ;;  %v3760_v57 = vld [vmem:[#allocation10 + $0x38] sm:$0xff]  }
 0x22e   :  { %2317 = vmatmul.mubr.bf16.vlgmr.msra.gmra.mrb[4].mxu0 %v1884_v55  ;;  %3171 = vmatprep.subr.bf16.mxu1 %v3751_v33  ;;  %v3758_v55 = vld [vmem:[#allocation10 + $0x28] sm:$0xff]  }
 0x22f   :  { %2328 = vmatpush1.bf16.msra.mxu0 %v3689_v59  ;;  %2359 = vmatprep.mubr.bf16.mxu0 %v1887_v58  ;;  %v3122_v59 = vld [vmem:[%s4185_s6] ss:$0 sm:$0xff] }
 0x230   :  { %2329 = vmatprep.subr.bf16.mxu0 %v3694_v60 }
 0x231   :  { %3172 = vmatpush3.bf16.msra.mxu1 %v3752_v34 }
 0x232   :  { %3197 = vmatprep.subr.bf16.mxu1 %v3956_v35 }
 0x233   :  { %2330 = vmatpush1.bf16.msra.mxu0 %v3692_v61 }
 0x234   :  { %2331 = vmatprep.subr.bf16.mxu0 %v3697_v62 }
 0x237   :  { %2332 = vmatpush1.bf16.msra.mxu0 %v3695_v63 }
 0x238   :  { %2333 = vmatprep.subr.bf16.mxu0 %v3700_v0 }
 0x23b   :  { %2334 = vmatpush1.bf16.msra.mxu0 %v3698_v1 }
 0x23c   :  { %2335 = vmatprep.subr.bf16.mxu0 %v3703_v2 }
 0x23f   :  { %2336 = vmatpush1.bf16.msra.mxu0 %v3701_v3 }
 0x240   :  { %2337 = vmatprep.subr.bf16.mxu0 %v3706_v4 }
 0x243   :  { %2338 = vmatpush1.bf16.msra.mxu0 %v3704_v5  ;;  %v3761_v5 = vld [vmem:[#allocation11] sm:$0xff]  }
 0x244   :  { %2339 = vmatprep.subr.bf16.mxu0 %v3709_v6 }
 0x247   :  { %2340 = vmatpush1.bf16.msra.mxu0 %v3707_v7  ;;  %v3762_v7 = vld [vmem:[#allocation11 + $0x8] sm:$0xff]  }
 0x248   :  { %2341 = vmatprep.subr.bf16.mxu0 %v3712_v8  ;;  %v3763_v8 = vld [vmem:[#allocation11 + $0x10] sm:$0xff]  }
 0x24b   :  { %2342 = vmatpush1.bf16.msra.mxu0 %v3710_v9  ;;  %v3764_v9 = vld [vmem:[#allocation11 + $0x18] sm:$0xff]  }
 0x24c   :  { %2343 = vmatprep.subr.bf16.mxu0 %v3715_v10  ;;  %v3765_v10 = vld [vmem:[#allocation11 + $0x20] sm:$0xff]  }
 0x24f   :  { %2344 = vmatpush1.bf16.msra.mxu0 %v3713_v11  ;;  %v3766_v11 = vld [vmem:[#allocation11 + $0x28] sm:$0xff]  }
 0x250   :  { %2345 = vmatprep.subr.bf16.mxu0 %v3718_v12  ;;  %v3767_v12 = vld [vmem:[#allocation11 + $0x30] sm:$0xff]  }
 0x253   :  { %2346 = vmatpush1.bf16.msra.mxu0 %v3716_v13  ;;  %v3768_v13 = vld [vmem:[#allocation11 + $0x38] sm:$0xff]  }
 0x254   :  { %2347 = vmatprep.subr.bf16.mxu0 %v3721_v14  ;;  %v3139_v14 = vld [vmem:[%s4187_s8] ss:$0 sm:$0xff]  ;;  %s3958_s8 = smov [#allocation13]  }
 0x257   :  { %2348 = vmatpush1.bf16.msra.mxu0 %v3719_v15 }
 0x258   :  { %2349 = vmatprep.subr.bf16.mxu0 %v3724_v16 }
 0x25b   :  { %2350 = vmatpush1.bf16.msra.mxu0 %v3722_v17 }
 0x25c   :  { %2351 = vmatprep.subr.bf16.mxu0 %v3727_v18 }
 0x25f   :  { %2352 = vmatpush1.bf16.msra.mxu0 %v3725_v19 }
 0x260   :  { %2353 = vmatprep.subr.bf16.mxu0 %v3730_v23 }
 0x263   :  { %2354 = vmatpush1.bf16.msra.mxu0 %v3728_v24 }
 0x264   :  { %2355 = vmatprep.subr.bf16.mxu0 %v3733_v26 }
 0x267   :  { %2356 = vmatpush1.bf16.msra.mxu0 %v3731_v27 }
 0x268   :  { %2357 = vmatprep.subr.bf16.mxu0 %v3736_v28  ;;  %v2783_v28 = vand.u32 127, %v356_v20 }
 0x26a   :  { %vm2784_vm1 = vcmp.lt.s32.totalorder %v2783_v28, 10 }
 0x26b   :  { %2358 = vmatpush1.bf16.msra.mxu0 %v3734_v29  ;;  %v3148_v29 = vld [vmem:[%s4189_s10] ss:$0 sm:$0xff]  ;;  %s2812_s10 = sshll.u32 %s3958_s8, 4  ;;  %s2813_s10 = int_to_ptr.vmem [resolvable:$true] %s2812_s10 }
 0x26c   :  { %s3909_s23 = scalar_lea.vmem %s2813_s10, 256  ;;  %p3914_p7 = scmp.lt.s32.totalorder %s2813_s10, %s2813_s10 }
 0x26d   :  { %p3910_p6 = scmp.ne.s32.totalorder %s2813_s10, %s3909_s23  ;;  %p3915_p8 = scmp.lt.s32.totalorder %s3909_s23, %s3909_s23 }
 0x26e   :  { %2360 = vmatmul.mubr.bf16.vlgmr.msra.gmra.mrb[4].mxu0 %v4124_v56  ;;  %v3759_v56 = vld [vmem:[#allocation10 + $0x30] sm:$0xff]  }
 0x26f   :  { %p3916_p9 = por %p3915_p8, %p3914_p7 }
 0x271   :  { %p3917_p10 = pnand %p3916_p9, %p3910_p6 }
 0x341   :  { %v2361_v39 = vpop.f32.mrb[4].mxu0 }
 0x342   :  { %v3245_v40 = vadd.f32 %v2361_v39, %v1957_v37  ;;  %v2363_v41 = vpop.f32.mrb[5].mxu0 }
 0x343   :  { %v3246_v42 = vadd.f32 %v2363_v41, %v1961_v38  ;;  %v2365_v43 = vpop.f32.mrb[6].mxu0 }
 0x344   :  { %v3247_v44 = vadd.f32 %v2365_v43, %v1957_v37  ;;  %v2367_v45 = vpop.f32.mrb[7].mxu0  ;;  %v2370_v47 = vmax.f32 %v3245_v40, 0.0 }
 0x345   :  { %v3248_v46 = vadd.f32 %v2367_v45, %v1961_v38  ;;  %v2371_v49 = vmax.f32 %v3246_v42, 0.0 }
 0x346   :  { %v2372_v48 = vmax.f32 %v3247_v44, 0.0 }
 0x347   :  { %v2373_v50 = vmax.f32 %v3248_v46, 0.0 }
 0x348   :  { %v2374_v51 = vpack.c.bf16 %v2372_v48, %v2370_v47 }
 0x349   :  { %v2375_v52 = vpack.c.bf16 %v2373_v50, %v2371_v49 }
 0x34b   :  { %2543 = vmatprep.mubr.bf16.mxu1 %v2375_v52 }
 0x34c   :  { %2544 = vmatmul.mubr.bf16.vlgmr.msra.gmra.mrb[4].mxu1 %v2374_v51 }
 0x34d   :  { %3198 = vmatpush3.bf16.msra.mxu1 %v3753_v53  ;;  %3213 = vmatprep.mubr.msk.bf16.mxu1 %vm3957_vm0, %v3956_v35 }
 0x34e   :  { %3199 = vmatprep.subr.bf16.mxu1 %v3956_v35 }
 0x351   :  { %3200 = vmatpush3.bf16.msra.mxu1 %v3754_v21 }
 0x352   :  { %3201 = vmatprep.subr.bf16.mxu1 %v3956_v35 }
 0x355   :  { %3202 = vmatpush3.bf16.msra.mxu1 %v3755_v22 }
 0x356   :  { %3203 = vmatprep.subr.bf16.mxu1 %v3956_v35 }
 0x359   :  { %3204 = vmatpush3.bf16.msra.mxu1 %v3756_v25 }
 0x35a   :  { %3205 = vmatprep.subr.bf16.mxu1 %v3956_v35 }
 0x35d   :  { %3206 = vmatpush3.bf16.msra.mxu1 %v3757_v54 }
 0x35e   :  { %3207 = vmatprep.subr.bf16.mxu1 %v3956_v35 }
 0x361   :  { %3208 = vmatpush3.bf16.msra.mxu1 %v3758_v55 }
 0x362   :  { %3209 = vmatprep.subr.bf16.mxu1 %v3956_v35 }
 0x365   :  { %3210 = vmatpush3.bf16.msra.mxu1 %v3759_v56 }
 0x366   :  { %3211 = vmatprep.subr.bf16.mxu1 %v3956_v35 }
 0x369   :  { %3212 = vmatpush3.bf16.msra.mxu1 %v3760_v57 }
 0x36a   :  { %3217 = vmatprep.subr.bf16.mxu1 %v3956_v35 }
 0x41f   :  { %v3173_v58 = vpop.f32.mrb[4].mxu1 }
 0x420   :  { %v3174_v60 = vpop.f32.mrb[5].mxu1 }
 0x421   :  { %v3175_v61 = vadd.f32 %v3174_v60, %v3173_v58  ;;  %v3176_v62 = vpop.f32.mrb[6].mxu1 }
 0x422   :  { %v3177_v63 = vpop.f32.mrb[7].mxu1 }
 0x423   :  { %v2546_v0 = vadd.f32 %v3175_v61, %v3122_v59  ;;  %v3178_v1 = vadd.f32 %v3177_v63, %v3176_v62 }
 0x425   :  { %v2549_v2 = vadd.f32 %v3178_v1, %v3122_v59  ;;  %v2552_v3 = vmax.f32 %v2546_v0, 0.0 }
 0x427   :  { %v2553_v4 = vmax.f32 %v2549_v2, 0.0 }
 0x429   :  { %v2554_v6 = vpack.c.bf16 %v2553_v4, %v2552_v3 }
 0x42b   :  { %3214 = vmatmul.mubr.bf16.vlgmr.msra.gmra.mrb[8].mxu1 %v2554_v6 }
 0x42c   :  { %3218 = vmatpush3.bf16.msra.mxu1 %v3761_v5  ;;  %3233 = vmatprep.mubr.msk.bf16.mxu1 %vm3957_vm0, %v3956_v35 }
 0x42d   :  { %3219 = vmatprep.subr.bf16.mxu1 %v3956_v35 }
 0x430   :  { %3220 = vmatpush3.bf16.msra.mxu1 %v3762_v7 }
 0x431   :  { %3221 = vmatprep.subr.bf16.mxu1 %v3956_v35 }
 0x434   :  { %3222 = vmatpush3.bf16.msra.mxu1 %v3763_v8 }
 0x435   :  { %3223 = vmatprep.subr.bf16.mxu1 %v3956_v35 }
 0x438   :  { %3224 = vmatpush3.bf16.msra.mxu1 %v3764_v9 }
 0x439   :  { %3225 = vmatprep.subr.bf16.mxu1 %v3956_v35 }
 0x43c   :  { %3226 = vmatpush3.bf16.msra.mxu1 %v3765_v10 }
 0x43d   :  { %3227 = vmatprep.subr.bf16.mxu1 %v3956_v35 }
 0x440   :  { %3228 = vmatpush3.bf16.msra.mxu1 %v3766_v11 }
 0x441   :  { %3229 = vmatprep.subr.bf16.mxu1 %v3956_v35 }
 0x444   :  { %3230 = vmatpush3.bf16.msra.mxu1 %v3767_v12 }
 0x445   :  { %3231 = vmatprep.subr.bf16.mxu1 %v3956_v35 }
 0x448   :  { %3232 = vmatpush3.bf16.msra.mxu1 %v3768_v13 }
 0x4fe   :  { %v2660_v15 = vpop.f32.mrb[8].mxu1 }
 0x4ff   :  { %v2661_v16 = vadd.f32 %v3139_v14, %v2660_v15  ;;  %v3215_v17 = vpop.f32.mrb[9].mxu1 }
 0x500   :  { %v2663_v18 = vpop.f32.mrb[10].mxu1 }
 0x501   :  { %v2664_v19 = vadd.f32 %v3139_v14, %v2663_v18  ;;  %v3216_v23 = vpop.f32.mrb[11].mxu1  ;;  %v2667_v24 = vmax.f32 %v2661_v16, 0.0 }
 0x503   :  { %v2668_v26 = vmax.f32 %v2664_v19, 0.0 }
 0x505   :  { %v2669_v27 = vpack.c.bf16 %v2668_v26, %v2667_v24 }
 0x507   :  { %3234 = vmatmul.mubr.bf16.vlgmr.msra.gmra.mrb[12].mxu1 %v2669_v27 }
 0x5da   :  { %v2775_v30 = vpop.f32.mrb[12].mxu1 }
 0x5db   :  { %v2776_v31 = vadd.f32 %v3148_v29, %v2775_v30  ;;  %v3235_v32 = vpop.f32.mrb[13].mxu1 }
 0x5dc   :  { %v2778_v33 = vpop.f32.mrb[14].mxu1 }
 0x5dd   :  { %v2779_v34 = vadd.f32 %v3148_v29, %v2778_v33  ;;  %v3236_v35 = vpop.f32.mrb[15].mxu1  ;;  %v2785_v36 = vsel %vm2784_vm1, %v2776_v31, -1e+30 }
 0x5de   :  { %2787 = vmax.xlane.f32.xlu0 %v2785_v36 }
 0x5df   :  { %v2786_v37 = vsel %vm2784_vm1, %v2779_v34, -1e+30 }
 0x5e2   :  { %2789 = vmax.xlane.f32.xlu0 %v2786_v37 }
 0x66b   :  { %v2788_v38 = vpop.xlane.xlu0 %2787 }
 0x66c   :  { %v2791_v39 = vsub.f32 %v2785_v36, %v2788_v38 }
 0x66e   :  { %v2793_v40 = vmul.f32 1.442695, %v2791_v39 }
 0x66f   :  { %v2790_v41 = vpop.xlane.xlu0 %2789 }
 0x670   :  { %3769 = vpow2.f32 %v2793_v40  ;;  %v2792_v20 = vsub.f32 %v2786_v37, %v2790_v41 }
 0x672   :  { %v2795_v42 = vmul.f32 1.442695, %v2792_v20 }
 0x674   :  { %3771 = vpow2.f32 %v2795_v42 }
 0x67a   :  { %v3770_v43 = vpop.eup %3769 }
 0x67b   :  { %2797 = vadd.xlane.f32.xlu1 %v3770_v43 }
 0x67e   :  { %v3772_v44 = vpop.eup %3771 }
 0x67f   :  { %2799 = vadd.xlane.f32.xlu1 %v3772_v44 }
 0x708   :  { %v2798_v45 = vpop.xlane.xlu1 %2797 }
 0x709   :  { %3773 = vrcp.f32 %v2798_v45 }
 0x70c   :  { %v2800_v46 = vpop.xlane.xlu1 %2799 }
 0x70d   :  { %3775 = vrcp.f32 %v2800_v46 }
 0x713   :  { %v3774_v47 = vpop.eup %3773 }
 0x714   :  { %v2802_v48 = vmul.f32 %v3774_v47, %v3770_v43 }
 0x716   :  { %2805 = vst [vmem:[#allocation13] sm:$0xff] %v2802_v48 }
 0x717   :  { %v3776_v49 = vpop.eup %3775 }
 0x718   :  { %v2804_v50 = vmul.f32 %v3776_v49, %v3772_v44 }
 0x71a   :  { %2806 = vst [vmem:[#allocation13 + $0x8] sm:$0xff] %v2804_v50 }
 0x71b   :  { %3920 = shalt.err (!%p3917_p10)
}
 0x71c   :  { %s3921_s3 = scalar_lea.hbm %s4190_s11, 256 }
 0x71d   :  { %p3922_p11 = scmp.ne.s32.totalorder %s4190_s11, %s3921_s3  ;;  %p3925_p12 = scmp.lt.u32.totalorder %s3921_s3, %s4190_s11 }
 0x71f   :  { %p3927_p13 = pnand %p3925_p12, %p3922_p11 }
 0x721   :  { %3930 = shalt.err (!%p3927_p13)
}
 0x722   :  { %2818 = dma.vmem_to_hbm [thread:$0]  %s2813_s10, 256, %s4190_s11, [#allocation4], %s3951_s0, %s3951_s0, %s3952_s26  }
 0x723   :  { %3939 = dma.done.wait [#allocation4], 256  }
 0x724   :  { %3940 = vsyncadd [#allocation4], 4294967040 }
 0x725   :  { %2822 = vsyncpa [#allocation3], 1 }
 0x726   :  { %2823 = vsyncpa [#allocation6], 1 }
 0x727   :  { %2824 = vsyncpa [#allocation9], 1 }
 0x728   :  { %2825 = vsyncpa [#allocation12], 1 }
 0x729   :  { %2826 = vsyncpa [#allocation4], 1 }

</bundles_post_ra>
